<compile_context>
chip_gen: v6e
topology: v6e:2x2x1
jax: 0.10.0
libtpu: 0.0.40
codegen_flags: <defaults>
</compile_context>

<pallas_src>
import functools

import jax
import jax.numpy as jnp
import numpy as np
from jax import lax
from jax.experimental import pallas as pl
from jax.experimental.pallas import tpu as pltpu


def _dense_layer_kernel(x_ref, mask_ref, s1_ref, b1_ref, w1_ref,
                        s2_ref, sh2_ref, w2_ref, c2b_ref,
                        out_ref, y3_ref, *, Sd, Sh, B_pad, P_pad,
                        C_mid, C_out_pad):
    """One batch element per grid step; channels on sublanes, voxels on lanes."""
    xp = x_ref[0]                                             # (C_in, P_pad)

    # BN1 (inference mode, folded scale/shift) + ReLU  -- lane-dense elementwise
    t = jnp.maximum(xp * s1_ref[...] + b1_ref[...], 0.0)

    # 1x1x1 Conv3d == channel matmul (N = P_pad lanes on the MXU)
    y = jnp.dot(w1_ref[...], t, preferred_element_type=jnp.float32)  # (C_mid, P_pad)

    # BN2 (folded; conv1 bias absorbed into shift) + ReLU, then zero the halo
    # rows / alignment tail so the 3x3x3 conv sees proper zero padding.
    y = jnp.maximum(y * s2_ref[...] + sh2_ref[...], 0.0) * mask_ref[...]

    # Fold the kw taps into the contraction axis:
    #   y3[j*C_mid + c, p] = y[c, p + j]     (j = 0, 1, 2)
    # Circular roll along lanes; wrapped elements land past every read index
    # used for a kept output row (see wrap-safety assert in the wrapper).
    y3_ref[0:C_mid, :] = y
    y3_ref[C_mid:2 * C_mid, :] = pltpu.roll(y, P_pad - 1, axis=1)
    y3_ref[2 * C_mid:3 * C_mid, :] = pltpu.roll(y, P_pad - 2, axis=1)
    y3 = y3_ref[...]          # single hoisted load (no CSE of repeated ref loads)

    # 3x3x3 Conv3d (padding=1): 9 matmuls with K = 3*C_mid (kw folded).  The
    # (kd, kh) tap shift is applied to the SMALL (C_out_pad, P_pad) matmul
    # output (XLU slot, ~6x less traffic than rolling y3) and accumulated.
    # conv2 bias is folded into the tap-0 accumulator init.
    acc = jnp.dot(w2_ref[0], y3, preferred_element_type=jnp.float32) + c2b_ref[...]
    for tap in range(1, 9):
        kd, kh = divmod(tap, 3)
        off = kd * Sd + kh * Sh
        full = jnp.dot(w2_ref[tap], y3, preferred_element_type=jnp.float32)
        acc = acc + pltpu.roll(full, P_pad - off, axis=1)     # shift left by off

    # Fully aligned, unmasked lane-dense store (C_out_pad % 8 == 0, B_pad % 128 == 0).
    out_ref[0] = acc[:, :B_pad].astype(out_ref.dtype)


def dense_layer_forward(x, params, growth_rate, kernel_size=3, eps=1e-5):
    """x: (N, C_in, D, H, W) float32 (NCDHW, like PyTorch).
    Returns (N, C_in + growth_rate, D, H, W)."""
    N, C_in, D, H, W = x.shape
    C_mid = growth_rate * 4
    C_out = growth_rate
    C_out_pad = max(8, ((C_out + 7) // 8) * 8)   # sublane-align output channels
    assert kernel_size == 3  # padding = 1

    # ---- fold parameters (glue) -------------------------------------------
    s1 = params["bn1_gamma"] / jnp.sqrt(params["bn1_var"] + eps)
    b1 = params["bn1_beta"] - params["bn1_mean"] * s1
    # conv1 weight: torch (C_mid, C_in, 1, 1, 1) -> (C_mid, C_in)
    w1 = params["conv1_w"].reshape(C_mid, C_in)
    s2 = params["bn2_gamma"] / jnp.sqrt(params["bn2_var"] + eps)
    sh2 = params["bn2_beta"] - params["bn2_mean"] * s2 + params["conv1_b"] * s2
    # conv2 weight: torch (C_out, C_mid, kd, kh, kw) -> (9, C_out_pad, 3*C_mid),
    # kw taps folded next to channels: W9[kd*3+kh, o, kw*C_mid + c].
    w2 = jnp.transpose(params["conv2_w"], (2, 3, 0, 4, 1)).reshape(
        9, C_out, 3 * C_mid)
    w2 = jnp.pad(w2, ((0, 0), (0, C_out_pad - C_out), (0, 0)))
    c2b = jnp.pad(params["conv2_b"], (0, C_out_pad - C_out))

    # ---- layout glue: NCDHW is channel-major already -> pad, flatten, align --
    Dp, Hp, Wp = D + 2, H + 2, W + 2
    Sd, Sh = Hp * Wp, Wp
    P = Dp * Hp * Wp
    P_pad = ((P + 127) // 128) * 128          # lane-align the voxel axis
    B = (D - 1) * Sd + (H - 1) * Sh + W       # accumulation span of valid rows
    B_pad = ((B + 127) // 128) * 128          # lane-dense (unmasked) stores
    max_off = 2 * Sd + 2 * Sh

    # Wrap-safety for the circular-roll trick: for every kept output row b < B
    # the deepest activation index touched is b + max_off + 2 (== P - 1); it
    # must stay strictly inside the un-wrapped lane range so neither the kw
    # fold nor the per-tap output roll feeds wrapped lanes into a kept row.
    assert (B - 1) + max_off + 2 < P_pad, (B, max_off, P_pad)
    assert B_pad <= P_pad
    # (Rows b in [B, B_pad) may contain wrapped garbage; they are sliced off.)

    x_pad = jnp.pad(x, ((0, 0), (0, 0), (1, 1), (1, 1), (1, 1)))
    x_flat = jnp.pad(x_pad.reshape(N, C_in, P),
                     ((0, 0), (0, 0), (0, P_pad - P)))

    # interior mask (1 inside original volume, 0 in zero halo / alignment tail)
    pd = jnp.arange(Dp)[:, None, None]
    ph = jnp.arange(Hp)[None, :, None]
    pw = jnp.arange(Wp)[None, None, :]
    interior = ((pd >= 1) & (pd <= D) & (ph >= 1) & (ph <= H)
                & (pw >= 1) & (pw <= W)).reshape(P)
    mask = jnp.pad(interior.astype(jnp.float32), (0, P_pad - P)).reshape(1, P_pad)

    kernel = functools.partial(_dense_layer_kernel, Sd=Sd, Sh=Sh, B_pad=B_pad,
                               P_pad=P_pad, C_mid=C_mid, C_out_pad=C_out_pad)

    # advisory cost estimate for the XLA scheduler
    flops = N * (2 * P_pad * C_in * C_mid
                 + 9 * 2 * P_pad * (3 * C_mid) * C_out_pad)
    bytes_accessed = 4 * (x_flat.size + N * C_out_pad * B_pad + w1.size
                          + w2.size + mask.size + 2 * C_in + 2 * C_mid
                          + C_out_pad)

    out_flat = pl.pallas_call(
        kernel,
        out_shape=jax.ShapeDtypeStruct((N, C_out_pad, B_pad), jnp.float32),
        grid_spec=pltpu.PrefetchScalarGridSpec(
            num_scalar_prefetch=0,
            grid=(N,),
            in_specs=[
                pl.BlockSpec((1, C_in, P_pad), lambda n: (n, 0, 0)),
                pl.BlockSpec((1, P_pad), lambda n: (0, 0)),
                pl.BlockSpec((C_in, 1), lambda n: (0, 0)),
                pl.BlockSpec((C_in, 1), lambda n: (0, 0)),
                pl.BlockSpec((C_mid, C_in), lambda n: (0, 0)),
                pl.BlockSpec((C_mid, 1), lambda n: (0, 0)),
                pl.BlockSpec((C_mid, 1), lambda n: (0, 0)),
                pl.BlockSpec((9, C_out_pad, 3 * C_mid), lambda n: (0, 0, 0)),
                pl.BlockSpec((C_out_pad, 1), lambda n: (0, 0)),
            ],
            out_specs=pl.BlockSpec((1, C_out_pad, B_pad), lambda n: (n, 0, 0)),
            scratch_shapes=[pltpu.VMEM((3 * C_mid, P_pad), jnp.float32)],
        ),
        compiler_params=pltpu.CompilerParams(
            dimension_semantics=("parallel",)),
        cost_estimate=pl.CostEstimate(flops=flops, transcendentals=0,
                                      bytes_accessed=bytes_accessed),
    )(x_flat, mask,
      s1.reshape(C_in, 1), b1.reshape(C_in, 1), w1,
      s2.reshape(C_mid, 1), sh2.reshape(C_mid, 1), w2,
      c2b.reshape(C_out_pad, 1))

    # ---- un-flatten (glue): rows b = d*Sd + h*Sh + w are the valid voxels --
    out_valid = out_flat[:, :C_out, :B]
    out_full = jnp.pad(out_valid, ((0, 0), (0, 0), (0, D * Sd - B)))
    out_new = out_full.reshape(N, C_out, D, Hp, Wp)[:, :, :, :H, :W]
    return jnp.concatenate([x, out_new], axis=1)


def dense_layer_ref(x, params, growth_rate, eps=1e-5):
    """Plain-JAX reference (inference-mode BN), NCDHW."""
    def bn(v, g, b, m, var):
        rs = lambda a: a.reshape(1, -1, 1, 1, 1)
        return (v - rs(m)) / jnp.sqrt(rs(var) + eps) * rs(g) + rs(b)

    out = jnp.maximum(bn(x, params["bn1_gamma"], params["bn1_beta"],
                         params["bn1_mean"], params["bn1_var"]), 0.0)
    out = lax.conv_general_dilated(
        out, params["conv1_w"], (1, 1, 1), "VALID",
        dimension_numbers=("NCDHW", "OIDHW", "NCDHW"))
    out = out + params["conv1_b"].reshape(1, -1, 1, 1, 1)
    out = jnp.maximum(bn(out, params["bn2_gamma"], params["bn2_beta"],
                         params["bn2_mean"], params["bn2_var"]), 0.0)
    out = lax.conv_general_dilated(
        out, params["conv2_w"], (1, 1, 1), [(1, 1), (1, 1), (1, 1)],
        dimension_numbers=("NCDHW", "OIDHW", "NCDHW"))
    out = out + params["conv2_b"].reshape(1, -1, 1, 1, 1)
    return jnp.concatenate([x, out], axis=1)


if __name__ == "__main__":
    N, C_in, D, H, W = 2, 4, 8, 8, 8
    growth_rate = 4
    C_mid = growth_rate * 4

    key = jax.random.PRNGKey(0)
    ks = jax.random.split(key, 13)
    x = jax.random.normal(ks[0], (N, C_in, D, H, W), jnp.float32)
    params = {
        "bn1_gamma": 1.0 + 0.1 * jax.random.normal(ks[1], (C_in,), jnp.float32),
        "bn1_beta": 0.1 * jax.random.normal(ks[2], (C_in,), jnp.float32),
        "bn1_mean": 0.1 * jax.random.normal(ks[3], (C_in,), jnp.float32),
        "bn1_var": jax.random.uniform(ks[4], (C_in,), jnp.float32, 0.5, 1.5),
        "conv1_w": 0.1 * jax.random.normal(ks[5], (C_mid, C_in, 1, 1, 1), jnp.float32),
        "conv1_b": 0.1 * jax.random.normal(ks[6], (C_mid,), jnp.float32),
        "bn2_gamma": 1.0 + 0.1 * jax.random.normal(ks[7], (C_mid,), jnp.float32),
        "bn2_beta": 0.1 * jax.random.normal(ks[8], (C_mid,), jnp.float32),
        "bn2_mean": 0.1 * jax.random.normal(ks[9], (C_mid,), jnp.float32),
        "bn2_var": jax.random.uniform(ks[10], (C_mid,), jnp.float32, 0.5, 1.5),
        "conv2_w": 0.1 * jax.random.normal(ks[11], (growth_rate, C_mid, 3, 3, 3),
                                           jnp.float32),
        "conv2_b": 0.1 * jax.random.normal(ks[12], (growth_rate,), jnp.float32),
    }

    out = dense_layer_forward(x, params, growth_rate)
    out = jax.block_until_ready(out)
    assert out.shape == (N, C_in + growth_rate, D, H, W)

    ref = dense_layer_ref(x, params, growth_rate)
    np.testing.assert_allclose(np.asarray(out), np.asarray(ref),
                               rtol=5e-4, atol=5e-4)
    print("KERNEL_OK")
</pallas_src>

<mosaic_0001>
module attributes {stable_mosaic.version = 11 : i64} {
  func.func @_dense_layer_kernel(%arg0: i32, %arg1: memref<1x4x1024xf32, #tpu.memory_space<vmem>>, %arg2: memref<1x1024xf32, #tpu.memory_space<vmem>>, %arg3: memref<4x1xf32, #tpu.memory_space<vmem>>, %arg4: memref<4x1xf32, #tpu.memory_space<vmem>>, %arg5: memref<16x4xf32, #tpu.memory_space<vmem>>, %arg6: memref<16x1xf32, #tpu.memory_space<vmem>>, %arg7: memref<16x1xf32, #tpu.memory_space<vmem>>, %arg8: memref<9x8x48xf32, #tpu.memory_space<vmem>>, %arg9: memref<8x1xf32, #tpu.memory_space<vmem>>, %arg10: memref<1x8x896xf32, #tpu.memory_space<vmem>>, %arg11: memref<48x1024xf32, #tpu.memory_space<vmem>>) attributes {dimension_semantics = [#tpu.dimension_semantics<parallel>], iteration_bounds = array<i64: 2>, scalar_prefetch = 0 : i64, scratch_operands = 1 : i64, tpu.core_type = #tpu.core_type<tc>, window_params = [{transform_indices = @transform_0, window_bounds = array<i64: 1, 4, 1024>}, {pipeline_mode = #tpu.pipeline_mode<synchronous>, transform_indices = @transform_1, window_bounds = array<i64: 1, 1024>}, {pipeline_mode = #tpu.pipeline_mode<synchronous>, transform_indices = @transform_2, window_bounds = array<i64: 4, 1>}, {pipeline_mode = #tpu.pipeline_mode<synchronous>, transform_indices = @transform_3, window_bounds = array<i64: 4, 1>}, {pipeline_mode = #tpu.pipeline_mode<synchronous>, transform_indices = @transform_4, window_bounds = array<i64: 16, 4>}, {pipeline_mode = #tpu.pipeline_mode<synchronous>, transform_indices = @transform_5, window_bounds = array<i64: 16, 1>}, {pipeline_mode = #tpu.pipeline_mode<synchronous>, transform_indices = @transform_6, window_bounds = array<i64: 16, 1>}, {pipeline_mode = #tpu.pipeline_mode<synchronous>, transform_indices = @transform_7, window_bounds = array<i64: 9, 8, 48>}, {pipeline_mode = #tpu.pipeline_mode<synchronous>, transform_indices = @transform_8, window_bounds = array<i64: 8, 1>}, {transform_indices = @transform_9, window_bounds = array<i64: 1, 8, 896>}]} {
    %c0 = arith.constant 0 : index
    %c0_0 = arith.constant 0 : index
    %c0_1 = arith.constant 0 : index
    %0 = vector.load %arg1[%c0, %c0_0, %c0_1] : memref<1x4x1024xf32, #tpu.memory_space<vmem>>, vector<1x4x1024xf32>
    %1 = vector.shape_cast %0 : vector<1x4x1024xf32> to vector<4x1024xf32>
    %c0_2 = arith.constant 0 : index
    %c0_3 = arith.constant 0 : index
    %2 = vector.load %arg3[%c0_2, %c0_3] : memref<4x1xf32, #tpu.memory_space<vmem>>, vector<4x1xf32>
    %3 = vector.broadcast %2 : vector<4x1xf32> to vector<4x1024xf32>
    %4 = arith.mulf %1, %3 : vector<4x1024xf32>
    %c0_4 = arith.constant 0 : index
    %c0_5 = arith.constant 0 : index
    %5 = vector.load %arg4[%c0_4, %c0_5] : memref<4x1xf32, #tpu.memory_space<vmem>>, vector<4x1xf32>
    %6 = vector.broadcast %5 : vector<4x1xf32> to vector<4x1024xf32>
    %7 = arith.addf %4, %6 : vector<4x1024xf32>
    %cst = arith.constant 0.000000e+00 : f32
    %8 = vector.broadcast %cst : f32 to vector<4x1024xf32>
    %9 = arith.maximumf %7, %8 : vector<4x1024xf32>
    %c0_6 = arith.constant 0 : index
    %c0_7 = arith.constant 0 : index
    %10 = vector.load %arg5[%c0_6, %c0_7] : memref<16x4xf32, #tpu.memory_space<vmem>>, vector<16x4xf32>
    %cst_8 = arith.constant dense<0.000000e+00> : vector<16x1024xf32>
    %11 = tpu.matmul %10, %9, %cst_8 {dimension_numbers = #tpu.dot_dimension_numbers<[1], [0], [0], [1], [0, 0, 1, 1], [], []>} : vector<16x4xf32>, vector<4x1024xf32>, vector<16x1024xf32> -> vector<16x1024xf32>
    %c0_9 = arith.constant 0 : index
    %c0_10 = arith.constant 0 : index
    %12 = vector.load %arg6[%c0_9, %c0_10] : memref<16x1xf32, #tpu.memory_space<vmem>>, vector<16x1xf32>
    %13 = vector.broadcast %12 : vector<16x1xf32> to vector<16x1024xf32>
    %14 = arith.mulf %11, %13 : vector<16x1024xf32>
    %c0_11 = arith.constant 0 : index
    %c0_12 = arith.constant 0 : index
    %15 = vector.load %arg7[%c0_11, %c0_12] : memref<16x1xf32, #tpu.memory_space<vmem>>, vector<16x1xf32>
    %16 = vector.broadcast %15 : vector<16x1xf32> to vector<16x1024xf32>
    %17 = arith.addf %14, %16 : vector<16x1024xf32>
    %cst_13 = arith.constant 0.000000e+00 : f32
    %18 = vector.broadcast %cst_13 : f32 to vector<16x1024xf32>
    %19 = arith.maximumf %17, %18 : vector<16x1024xf32>
    %c0_14 = arith.constant 0 : index
    %c0_15 = arith.constant 0 : index
    %20 = vector.load %arg2[%c0_14, %c0_15] : memref<1x1024xf32, #tpu.memory_space<vmem>>, vector<1x1024xf32>
    %21 = vector.broadcast %20 : vector<1x1024xf32> to vector<16x1024xf32>
    %22 = arith.mulf %19, %21 : vector<16x1024xf32>
    %c0_16 = arith.constant 0 : index
    %c0_17 = arith.constant 0 : index
    %23 = vector.load %arg11[%c0_16, %c0_17] : memref<48x1024xf32, #tpu.memory_space<vmem>>, vector<16x1024xf32>
    tpu.vector_store %arg11[%c0_16, %c0_17], %22 {strides = array<i32>} : memref<48x1024xf32, #tpu.memory_space<vmem>>, vector<16x1024xf32>,
    %c1023_i32 = arith.constant 1023 : i32
    %24 = tpu.dynamic_rotate %22 by %c1023_i32 dim 1 : vector<16x1024xf32>, i32 -> vector<16x1024xf32>
    %c16 = arith.constant 16 : index
    %c0_18 = arith.constant 0 : index
    %25 = vector.load %arg11[%c16, %c0_18] : memref<48x1024xf32, #tpu.memory_space<vmem>>, vector<16x1024xf32>
    tpu.vector_store %arg11[%c16, %c0_18], %24 {strides = array<i32>} : memref<48x1024xf32, #tpu.memory_space<vmem>>, vector<16x1024xf32>,
    %c1022_i32 = arith.constant 1022 : i32
    %26 = tpu.dynamic_rotate %22 by %c1022_i32 dim 1 : vector<16x1024xf32>, i32 -> vector<16x1024xf32>
    %c32 = arith.constant 32 : index
    %c0_19 = arith.constant 0 : index
    %27 = vector.load %arg11[%c32, %c0_19] : memref<48x1024xf32, #tpu.memory_space<vmem>>, vector<16x1024xf32>
    tpu.vector_store %arg11[%c32, %c0_19], %26 {strides = array<i32>} : memref<48x1024xf32, #tpu.memory_space<vmem>>, vector<16x1024xf32>,
    %c0_20 = arith.constant 0 : index
    %c0_21 = arith.constant 0 : index
    %28 = vector.load %arg11[%c0_20, %c0_21] : memref<48x1024xf32, #tpu.memory_space<vmem>>, vector<48x1024xf32>
    %c0_22 = arith.constant 0 : index
    %c0_23 = arith.constant 0 : index
    %c0_24 = arith.constant 0 : index
    %29 = vector.load %arg8[%c0_22, %c0_23, %c0_24] : memref<9x8x48xf32, #tpu.memory_space<vmem>>, vector<1x8x48xf32>
    %30 = vector.shape_cast %29 : vector<1x8x48xf32> to vector<8x48xf32>
    %cst_25 = arith.constant dense<0.000000e+00> : vector<8x1024xf32>
    %31 = tpu.matmul %30, %28, %cst_25 {dimension_numbers = #tpu.dot_dimension_numbers<[1], [0], [0], [1], [0, 0, 1, 1], [], []>} : vector<8x48xf32>, vector<48x1024xf32>, vector<8x1024xf32> -> vector<8x1024xf32>
    %c0_26 = arith.constant 0 : index
    %c0_27 = arith.constant 0 : index
    %32 = vector.load %arg9[%c0_26, %c0_27] : memref<8x1xf32, #tpu.memory_space<vmem>>, vector<8x1xf32>
    %33 = vector.broadcast %32 : vector<8x1xf32> to vector<8x1024xf32>
    %34 = arith.addf %31, %33 : vector<8x1024xf32>
    %c1 = arith.constant 1 : index
    %c0_28 = arith.constant 0 : index
    %c0_29 = arith.constant 0 : index
    %35 = vector.load %arg8[%c1, %c0_28, %c0_29] : memref<9x8x48xf32, #tpu.memory_space<vmem>>, vector<1x8x48xf32>
    %36 = vector.shape_cast %35 : vector<1x8x48xf32> to vector<8x48xf32>
    %cst_30 = arith.constant dense<0.000000e+00> : vector<8x1024xf32>
    %37 = tpu.matmul %36, %28, %cst_30 {dimension_numbers = #tpu.dot_dimension_numbers<[1], [0], [0], [1], [0, 0, 1, 1], [], []>} : vector<8x48xf32>, vector<48x1024xf32>, vector<8x1024xf32> -> vector<8x1024xf32>
    %c1014_i32 = arith.constant 1014 : i32
    %38 = tpu.dynamic_rotate %37 by %c1014_i32 dim 1 : vector<8x1024xf32>, i32 -> vector<8x1024xf32>
    %39 = arith.addf %34, %38 : vector<8x1024xf32>
    %c2 = arith.constant 2 : index
    %c0_31 = arith.constant 0 : index
    %c0_32 = arith.constant 0 : index
    %40 = vector.load %arg8[%c2, %c0_31, %c0_32] : memref<9x8x48xf32, #tpu.memory_space<vmem>>, vector<1x8x48xf32>
    %41 = vector.shape_cast %40 : vector<1x8x48xf32> to vector<8x48xf32>
    %cst_33 = arith.constant dense<0.000000e+00> : vector<8x1024xf32>
    %42 = tpu.matmul %41, %28, %cst_33 {dimension_numbers = #tpu.dot_dimension_numbers<[1], [0], [0], [1], [0, 0, 1, 1], [], []>} : vector<8x48xf32>, vector<48x1024xf32>, vector<8x1024xf32> -> vector<8x1024xf32>
    %c1004_i32 = arith.constant 1004 : i32
    %43 = tpu.dynamic_rotate %42 by %c1004_i32 dim 1 : vector<8x1024xf32>, i32 -> vector<8x1024xf32>
    %44 = arith.addf %39, %43 : vector<8x1024xf32>
    %c3 = arith.constant 3 : index
    %c0_34 = arith.constant 0 : index
    %c0_35 = arith.constant 0 : index
    %45 = vector.load %arg8[%c3, %c0_34, %c0_35] : memref<9x8x48xf32, #tpu.memory_space<vmem>>, vector<1x8x48xf32>
    %46 = vector.shape_cast %45 : vector<1x8x48xf32> to vector<8x48xf32>
    %cst_36 = arith.constant dense<0.000000e+00> : vector<8x1024xf32>
    %47 = tpu.matmul %46, %28, %cst_36 {dimension_numbers = #tpu.dot_dimension_numbers<[1], [0], [0], [1], [0, 0, 1, 1], [], []>} : vector<8x48xf32>, vector<48x1024xf32>, vector<8x1024xf32> -> vector<8x1024xf32>
    %c924_i32 = arith.constant 924 : i32
    %48 = tpu.dynamic_rotate %47 by %c924_i32 dim 1 : vector<8x1024xf32>, i32 -> vector<8x1024xf32>
    %49 = arith.addf %44, %48 : vector<8x1024xf32>
    %c4 = arith.constant 4 : index
    %c0_37 = arith.constant 0 : index
    %c0_38 = arith.constant 0 : index
    %50 = vector.load %arg8[%c4, %c0_37, %c0_38] : memref<9x8x48xf32, #tpu.memory_space<vmem>>, vector<1x8x48xf32>
    %51 = vector.shape_cast %50 : vector<1x8x48xf32> to vector<8x48xf32>
    %cst_39 = arith.constant dense<0.000000e+00> : vector<8x1024xf32>
    %52 = tpu.matmul %51, %28, %cst_39 {dimension_numbers = #tpu.dot_dimension_numbers<[1], [0], [0], [1], [0, 0, 1, 1], [], []>} : vector<8x48xf32>, vector<48x1024xf32>, vector<8x1024xf32> -> vector<8x1024xf32>
    %c914_i32 = arith.constant 914 : i32
    %53 = tpu.dynamic_rotate %52 by %c914_i32 dim 1 : vector<8x1024xf32>, i32 -> vector<8x1024xf32>
    %54 = arith.addf %49, %53 : vector<8x1024xf32>
    %c5 = arith.constant 5 : index
    %c0_40 = arith.constant 0 : index
    %c0_41 = arith.constant 0 : index
    %55 = vector.load %arg8[%c5, %c0_40, %c0_41] : memref<9x8x48xf32, #tpu.memory_space<vmem>>, vector<1x8x48xf32>
    %56 = vector.shape_cast %55 : vector<1x8x48xf32> to vector<8x48xf32>
    %cst_42 = arith.constant dense<0.000000e+00> : vector<8x1024xf32>
    %57 = tpu.matmul %56, %28, %cst_42 {dimension_numbers = #tpu.dot_dimension_numbers<[1], [0], [0], [1], [0, 0, 1, 1], [], []>} : vector<8x48xf32>, vector<48x1024xf32>, vector<8x1024xf32> -> vector<8x1024xf32>
    %c904_i32 = arith.constant 904 : i32
    %58 = tpu.dynamic_rotate %57 by %c904_i32 dim 1 : vector<8x1024xf32>, i32 -> vector<8x1024xf32>
    %59 = arith.addf %54, %58 : vector<8x1024xf32>
    %c6 = arith.constant 6 : index
    %c0_43 = arith.constant 0 : index
    %c0_44 = arith.constant 0 : index
    %60 = vector.load %arg8[%c6, %c0_43, %c0_44] : memref<9x8x48xf32, #tpu.memory_space<vmem>>, vector<1x8x48xf32>
    %61 = vector.shape_cast %60 : vector<1x8x48xf32> to vector<8x48xf32>
    %cst_45 = arith.constant dense<0.000000e+00> : vector<8x1024xf32>
    %62 = tpu.matmul %61, %28, %cst_45 {dimension_numbers = #tpu.dot_dimension_numbers<[1], [0], [0], [1], [0, 0, 1, 1], [], []>} : vector<8x48xf32>, vector<48x1024xf32>, vector<8x1024xf32> -> vector<8x1024xf32>
    %c824_i32 = arith.constant 824 : i32
    %63 = tpu.dynamic_rotate %62 by %c824_i32 dim 1 : vector<8x1024xf32>, i32 -> vector<8x1024xf32>
    %64 = arith.addf %59, %63 : vector<8x1024xf32>
    %c7 = arith.constant 7 : index
    %c0_46 = arith.constant 0 : index
    %c0_47 = arith.constant 0 : index
    %65 = vector.load %arg8[%c7, %c0_46, %c0_47] : memref<9x8x48xf32, #tpu.memory_space<vmem>>, vector<1x8x48xf32>
    %66 = vector.shape_cast %65 : vector<1x8x48xf32> to vector<8x48xf32>
    %cst_48 = arith.constant dense<0.000000e+00> : vector<8x1024xf32>
    %67 = tpu.matmul %66, %28, %cst_48 {dimension_numbers = #tpu.dot_dimension_numbers<[1], [0], [0], [1], [0, 0, 1, 1], [], []>} : vector<8x48xf32>, vector<48x1024xf32>, vector<8x1024xf32> -> vector<8x1024xf32>
    %c814_i32 = arith.constant 814 : i32
    %68 = tpu.dynamic_rotate %67 by %c814_i32 dim 1 : vector<8x1024xf32>, i32 -> vector<8x1024xf32>
    %69 = arith.addf %64, %68 : vector<8x1024xf32>
    %c8 = arith.constant 8 : index
    %c0_49 = arith.constant 0 : index
    %c0_50 = arith.constant 0 : index
    %70 = vector.load %arg8[%c8, %c0_49, %c0_50] : memref<9x8x48xf32, #tpu.memory_space<vmem>>, vector<1x8x48xf32>
    %71 = vector.shape_cast %70 : vector<1x8x48xf32> to vector<8x48xf32>
    %cst_51 = arith.constant dense<0.000000e+00> : vector<8x1024xf32>
    %72 = tpu.matmul %71, %28, %cst_51 {dimension_numbers = #tpu.dot_dimension_numbers<[1], [0], [0], [1], [0, 0, 1, 1], [], []>} : vector<8x48xf32>, vector<48x1024xf32>, vector<8x1024xf32> -> vector<8x1024xf32>
    %c804_i32 = arith.constant 804 : i32
    %73 = tpu.dynamic_rotate %72 by %c804_i32 dim 1 : vector<8x1024xf32>, i32 -> vector<8x1024xf32>
    %74 = arith.addf %69, %73 : vector<8x1024xf32>
    %75 = vector.extract_strided_slice %74 {offsets = [0, 0], sizes = [8, 896], strides = [1, 1]} : vector<8x1024xf32> to vector<8x896xf32>
    %c0_52 = arith.constant 0 : index
    %c0_53 = arith.constant 0 : index
    %c0_54 = arith.constant 0 : index
    %76 = vector.load %arg10[%c0_52, %c0_53, %c0_54] : memref<1x8x896xf32, #tpu.memory_space<vmem>>, vector<1x8x896xf32>
    %77 = vector.shape_cast %76 : vector<1x8x896xf32> to vector<8x896xf32>
    %78 = vector.shape_cast %75 : vector<8x896xf32> to vector<1x8x896xf32>
    tpu.vector_store %arg10[%c0_52, %c0_53, %c0_54], %78 {strides = array<i32>} : memref<1x8x896xf32, #tpu.memory_space<vmem>>, vector<1x8x896xf32>,
    return
  }
  func.func @transform_0(%arg0: i32) -> (i32, i32, i32) {
    %c0_i32 = arith.constant 0 : i32
    %c0_i32_0 = arith.constant 0 : i32
    %c0_i32_1 = arith.constant 0 : i32
    return %arg0, %c0_i32, %c0_i32_0 : i32, i32, i32
  }
  func.func @transform_1(%arg0: i32) -> (i32, i32) {
    %c0_i32 = arith.constant 0 : i32
    %c0_i32_0 = arith.constant 0 : i32
    %c0_i32_1 = arith.constant 0 : i32
    return %c0_i32, %c0_i32_0 : i32, i32
  }
  func.func @transform_2(%arg0: i32) -> (i32, i32) {
    %c0_i32 = arith.constant 0 : i32
    %c0_i32_0 = arith.constant 0 : i32
    %c0_i32_1 = arith.constant 0 : i32
    return %c0_i32, %c0_i32_0 : i32, i32
  }
  func.func @transform_3(%arg0: i32) -> (i32, i32) {
    %c0_i32 = arith.constant 0 : i32
    %c0_i32_0 = arith.constant 0 : i32
    %c0_i32_1 = arith.constant 0 : i32
    return %c0_i32, %c0_i32_0 : i32, i32
  }
  func.func @transform_4(%arg0: i32) -> (i32, i32) {
    %c0_i32 = arith.constant 0 : i32
    %c0_i32_0 = arith.constant 0 : i32
    %c0_i32_1 = arith.constant 0 : i32
    return %c0_i32, %c0_i32_0 : i32, i32
  }
  func.func @transform_5(%arg0: i32) -> (i32, i32) {
    %c0_i32 = arith.constant 0 : i32
    %c0_i32_0 = arith.constant 0 : i32
    %c0_i32_1 = arith.constant 0 : i32
    return %c0_i32, %c0_i32_0 : i32, i32
  }
  func.func @transform_6(%arg0: i32) -> (i32, i32) {
    %c0_i32 = arith.constant 0 : i32
    %c0_i32_0 = arith.constant 0 : i32
    %c0_i32_1 = arith.constant 0 : i32
    return %c0_i32, %c0_i32_0 : i32, i32
  }
  func.func @transform_7(%arg0: i32) -> (i32, i32, i32) {
    %c0_i32 = arith.constant 0 : i32
    %c0_i32_0 = arith.constant 0 : i32
    %c0_i32_1 = arith.constant 0 : i32
    %c0_i32_2 = arith.constant 0 : i32
    return %c0_i32, %c0_i32_0, %c0_i32_1 : i32, i32, i32
  }
  func.func @transform_8(%arg0: i32) -> (i32, i32) {
    %c0_i32 = arith.constant 0 : i32
    %c0_i32_0 = arith.constant 0 : i32
    %c0_i32_1 = arith.constant 0 : i32
    return %c0_i32, %c0_i32_0 : i32, i32
  }
  func.func @transform_9(%arg0: i32) -> (i32, i32, i32) {
    %c0_i32 = arith.constant 0 : i32
    %c0_i32_0 = arith.constant 0 : i32
    %c0_i32_1 = arith.constant 0 : i32
    return %arg0, %c0_i32, %c0_i32_0 : i32, i32, i32
  }
}

</mosaic_0001>

<bundles_post_ra>
// kernel: tpu_custom_call.1
= control target key start
LH: loop header
LB: loop body
LE: loop exit
PB: predicated region body
PF: predicated region fallthrough
CT: control target
= control target key end

     0   :  { %14 = vsyncpa [#allocation4], 0  ;;  %s5556_s0 = inlined_call_operand.hbm [shape: f32[2,4,1024], index: 0, kind: input, shape index: {}]   ;;  %s5557_s1 = inlined_call_operand.vmem [shape: f32[1,1024], index: 1, kind: input, shape index: {}]   ;;  %s5558_s2 = inlined_call_operand.vmem [shape: f32[4,1], index: 2, kind: input, shape index: {}]   ;;  %s5559_s3 = inlined_call_operand.vmem [shape: f32[4,1], index: 3, kind: input, shape index: {}]   ;;  %s5560_s4 = inlined_call_operand.vmem [shape: f32[16,4], index: 4, kind: input, shape index: {}]   ;;  %s5561_s5 = inlined_call_operand.vmem [shape: f32[16,1], index: 5, kind: input, shape index: {}]   ;;  %s5562_s6 = inlined_call_operand.vmem [shape: f32[16,1], index: 6, kind: input, shape index: {}]   ;;  %s5563_s7 = inlined_call_operand.vmem [shape: f32[9,8,48], index: 7, kind: input, shape index: {}]   ;;  %s5564_s8 = inlined_call_operand.vmem [shape: f32[8,1], index: 8, kind: input, shape index: {}]   ;;  %s5565_s9 = inlined_call_operand.hbm [shape: f32[2,8,896], index: 9, kind: output, shape index: {}]  }
   0x1   :  { %16 = vsyncpa [#allocation4 + $0x1], 0 }
   0x2   :  { %17 = vsyncpa [#allocation5], 0 }
   0x3   :  { %19 = vsyncpa [#allocation5 + $0x1], 0  ;;  %s4299_s30 = smov 0   ;;  %s4301_s10 = smov 0  }
   0x4   :  { %s4303_s11 = smov 0   ;;  %s4305_s12 = smov 0  }
   0x5 LB: > { %5569 = sst [smem:[#allocation9_spill]] %s4228_s11  ;;  %s4320_s13 = sadd.s32 4294967295, %s4232_s12   ;;  %s4232_s12 = sphi %s4305_s12, %s5586_s12   ;;  %s4228_s11 = sphi %s4303_s11, %s5583_s11   ;;  %s4224_s10 = sphi %s4301_s10, %s5585_s10   ;;  %s4220_s30 = sphi %s4299_s30, %s5584_s30  }
   0x6   : > { %s4005_s14 = sadd.s32 4294967294, %s4232_s12   ;;  %s4324_s15 = sadd.s32 1, %s4232_s12  }
   0x7   : > { %s32_s16 = sadd.s32 1, %s4228_s11  ;;  %s29_s17 = ssub.s32 %s4232_s12, %s4324_s15 }
   0x8   : > { %p39_p0 = scmp.ne.s32.totalorder %s4228_s11, %s4224_s10  ;;  %p30_p1 = scmp.eq.s32.totalorder %s29_s17, 0 }
   0x9   : > { %p40_p2 = scmp.eq.s32.totalorder %s4232_s12, 0  ;;  %p45_p3 = scmp.ne.s32.totalorder %s4224_s10, %s4220_s30 }
   0xa   : > { %p46_p4 = scmp.eq.s32.totalorder %s4320_s13, 0  ;;  %p237_p7 = scmp.eq.s32.totalorder %s4320_s13, 1 }
   0xb   : > { %s4336_s18 = scalar_select %p30_p1, %s4228_s11, %s32_s16  }
   0xc   : > { %p4338_p5 = por %p40_p2, %p39_p0  ;;  %p4342_p6 = por %p46_p4, %p45_p3 }
   0xd   : > { %5570 = sst [smem:[#allocation10_spill]] %s4336_s18  ;;  %p243_p8 = scmp.eq.s32.totalorder %s4005_s14, 1 }
   0xe   : > { %s5572_s20 = scalar_select %p4342_p6, 1, 0 }
   0xf   : > { %p4091_p10 = scmp.lt.s32.totalorder %s4232_s12, 2  ;;  %p4349_p11 = por %p237_p7, %p39_p0 }
  0x10   : > { %p4353_p12 = por %p243_p8, %p45_p3  ;;  %s287_s23 = sand.u32 1, %s4228_s11  }
  0x11   : > { %s5573_s21 = scalar_select %p4349_p11, 1, 0 }
  0x12   : > { %s5574_s22 = scalar_select %p4353_p12, 1, 0 }
  0x13   : > { %s4076_s24 = sshll.u32 %s4232_s12, 9  ;;  %s4008_s25 = sshll.u32 %s287_s23, 5 }
  0x14   : > { %s4362_s28 = scalar_lea.hbm %s5556_s0, %s4076_s24  ;;  %s291_s29 = scalar_lea.vmem [#allocation3], %s4008_s25 }
  0x15   : > { %s299_s14 = sshll.u32 %s291_s29, 4  ;;  %p4366_p13 = pnand %p4091_p10, %p4338_p5  ;;  %s4370_s14 = int_to_ptr.vmem [resolvable:$true] %s299_s14 }
  0x16   : > { %s288_s17 = scalar_lea.sflag [#allocation4], %s287_s23  ;;  %s4140_s18 = scalar_lea.hbm %s4362_s28, 512 }
  0x17   : > { %p4141_p2 = scmp.ne.s32.totalorder %s4362_s28, %s4140_s18  ;;  %p4142_p3 = pneg %p4366_p13 }
  0x18   : > { %s4145_s19 = scalar_lea.hbm %s5556_s0, 1024  ;;  %p4146_p5 = scmp.lt.s32.totalorder %s4362_s28, %s5556_s0 }
  0x19   : > { %p4143_p4 = pnand %p4142_p3, %p4141_p2  ;;  %p4147_p8 = scmp.lt.s32.totalorder %s4145_s19, %s4140_s18 }
  0x1b   : > { %p4144_p7 = pneg %p4143_p4  ;;  %p4148_p10 = por %p4147_p8, %p4146_p5 }
  0x1d   : > { %p4149_p9 = pnand %p4148_p10, %p4144_p7 }
  0x1f   : > { %4152 = shalt.err (!%p4149_p9)
}
  0x20   : > { %s4153_s23 = scalar_lea.vmem %s4370_s14, 512  ;;  %s4234_s29 = smov [#allocation3]  }
  0x21   : > { %p4154_p0 = scmp.ne.s32.totalorder %s4370_s14, %s4153_s23  ;;  %s4158_s11 = sshll.u32 %s4234_s29, 4  ;;  %s4159_s11 = int_to_ptr.vmem [resolvable:$false] %s4158_s11 }
  0x22   : > { %s4160_s24 = scalar_lea.vmem %s4159_s11, 1024  ;;  %p4161_p4 = scmp.lt.s32.totalorder %s4370_s14, %s4159_s11 }
  0x23   : > { %p4156_p1 = pnand %p4154_p0, %p4142_p3  ;;  %p4162_p12 = scmp.lt.s32.totalorder %s4160_s24, %s4153_s23 }
  0x25   : > { %p4157_p2 = pneg %p4156_p1  ;;  %p4163_p11 = por %p4162_p12, %p4161_p4 }
  0x27   : > { %p4164_p6 = pnand %p4163_p11, %p4157_p2 }
  0x29   : > { %4167 = shalt.err (!%p4164_p6)
}
  0x2a   : > { %4086 = dma.hbm_to_vmem [thread:$0]  (!%p4366_p13), %s4362_s28, 512, %s4370_s14, %s288_s17  }
  0x2b   : > { %p5576_p9 = scmp.lt.s32.totalorder %s4232_s12, 3  ;;  %p5577_p7 = scmp.ge.s32.totalorder %s4232_s12, 1 }
  0x2d   : > { %p305_p0 = pnand %p5577_p7, %p5576_p9 }
  0x2e   : > { %s4397_s18 = sand.u32 (!%p305_p0), 1, %s4224_s10   ;;  %p5578_p6 = scmp.ne.s32.totalorder (!%p305_p0), %s5572_s20, 0 }
  0x2f   : > { %308 = sbr.rel (%p305_p0) target bundleno = 1129 (0x469), region = 56  ;;  %s4012_s11 = sshll.u32 (!%p305_p0), %s4397_s18, 5 }
  0x30   : > { %s311_s25 = scalar_lea.sflag (!%p305_p0), [#allocation4], %s4397_s18  ;;  %s4401_s19 = scalar_lea.vmem (!%p305_p0), [#allocation3], %s4012_s11 }
  0x34   : > { %4211 = dma.done.wait (%p5578_p6), %s311_s25, 512  }
  0x35   : > { %4213 = vsyncadd (%p5578_p6), %s311_s25, 4294966784  ;;  %v4235_v0 = vmov 0   ;;  %v353_v1 = vld [vmem:[%s5558_s2] sm:$0xf]  ;;  %v762_v3 = vld [vmem:[%s5562_s6 + $0x8] sm:$0xff]  ;;  %v4236_v4 = vmov 0.0   ;;  %v361_v10 = vlaneseq }
  0x36   : > { %4138 = vset.pattern.permute.xlu0 %v4235_v0  ;;  %4139 = vset.pattern.permute.xlu1 %v4235_v0  ;;  %v370_v2 = vld [vmem:[%s5559_s3] sm:$0xf]  ;;  %v734_v5 = vld [vmem:[%s5561_s5 + $0x8] sm:$0xff]  ;;  %v4237_v8 = vmov 839922192   ;;  %v351_v15 = vld [vmem:[%s4401_s19 + $0x10] sm:$0xff] }
  0x37   : > { %356 = vperm.xlu0 %4138, %v353_v1   ;;  %489 = vmatprep.mubr.f32.mxu0 %v4236_v4  ;;  %v733_v6 = vld [vmem:[%s5561_s5] sm:$0xff]  ;;  %v359_v9 = vunpack.c.l.s4 %v4237_v8  ;;  %v4428_v12 = vshrl.u32 %v361_v10, 7  ;;  %v352_v17 = vld [vmem:[%s4401_s19 + $0x18] sm:$0xff]  ;;  %v350_v19 = vld [vmem:[%s4401_s19 + $0x8] sm:$0xff]  ;;  %vm408_vm0 = vcmask 1043456   ;;  %vm401_vm1 = vcmask 31744  }
  0x38   : > { %566 = vmatprep.mubr.f32.mxu1 %v4236_v4  ;;  %742 = vperm.xlu1 %4139, %v734_v5   ;;  %v761_v7 = vld [vmem:[%s5562_s6] sm:$0xff]  ;;  %v392_v39 = vld [vmem:[%s5560_s4 + $0x8] sm:$0xff]  ;;  %s4238_s27 = smov 126   ;;  %s4239_s20 = smov 127   ;;  %vm1066_vm4 = vcmask 392192  }
  0x39   : > { %v360_v11 = vunpack.c.0.s8 %v359_v9  ;;  %v349_v18 = vld [vmem:[%s4401_s19] sm:$0xff]  ;;  %v809_v42 = vsub.s32 0, %v4428_v12  ;;  %v817_v43 = vsub.s32 2, %v4428_v12  ;;  %v813_v1 = vsub.s32 1, %v4428_v12  ;;  %s4240_s19 = smov 118   ;;  %s4241_s16 = smov 108  }
  0x3a   : > { %v391_v36 = vld [vmem:[%s5560_s4] sm:$0xff]  ;;  %s4242_s17 = smov 28   ;;  %s4243_s26 = smov 18  }
  0x3b   : > { %373 = vperm.xlu0 %4138, %v370_v2   ;;  %v363_v13 = vsub.s32 %v360_v11, %v4428_v12  ;;  %v4474_v45 = vld [vmem:[%s5557_s1] sm:$0xff]  ;;  %s4246_s23 = smov 46   ;;  %s4247_s29 = smov 36  }
  0x3c   : > { %737 = vperm.xlu1 %4139, %v733_v6   ;;  %v810_v52 = vrot.slane %v4474_v45, %v809_v42  ;;  %v818_v54 = vrot.slane %v4474_v45, %v817_v43  ;;  %v814_v11 = vrot.slane %v4474_v45, %v813_v1  ;;  %v829_v43 = vsub.s32 5, %v4428_v12  ;;  %s4077_s24 = smul.u32 56, %s4397_s18  ;;  %p5579_p12 = scmp.ne.s32.totalorder %s5573_s21, 0 }
  0x3d   : > { %s4078_s25 = smul.u32 896, %s4320_s13 }
  0x3e   : > { %s5459_s11 = scalar_lea.vmem [#allocation6], %s4077_s24 }
  0x3f   : > { %770 = vperm.xlu0 %4138, %v762_v3   ;;  %s3935_s28 = sshll.u32 %s5459_s11, 4  ;;  %s3936_s28 = int_to_ptr.vmem [resolvable:$true] %s3935_s28 }
  0x40   : > { %765 = vperm.xlu1 %4139, %v761_v7  }
  0xb2   : > { %v357_v14 = vpop.permute.xlu0 %356 }
  0xb3   : > { %v364_v16 = vrot.slane %v357_v14, %v363_v13  ;;  %v4465_v40 = vpop.permute.xlu1 %742  ;;  %v821_v14 = vsub.s32 3, %v4428_v12 }
  0xb5   : > { %v368_v20 = vmul.f32 %v364_v16, %v351_v15  ;;  %v369_v22 = vmul.f32 %v364_v16, %v352_v17  ;;  %v366_v24 = vmul.f32 %v364_v16, %v349_v18  ;;  %v367_v25 = vmul.f32 %v364_v16, %v350_v19 }
  0xb6   : > { %v374_v21 = vpop.permute.xlu0 %373 }
  0xb7   : > { %v381_v23 = vrot.slane %v374_v21, %v363_v13  ;;  %v4467_v41 = vpop.permute.xlu1 %737  ;;  %v822_v21 = vrot.slane %v4474_v45, %v821_v14 }
  0xb9   : > { %v385_v26 = vadd.f32 %v381_v23, %v368_v20  ;;  %v386_v27 = vadd.f32 %v381_v23, %v369_v22  ;;  %v383_v28 = vadd.f32 %v381_v23, %v366_v24  ;;  %v384_v29 = vadd.f32 %v381_v23, %v367_v25 }
  0xba   : > { %v4486_v61 = vpop.permute.xlu0 %770 }
  0xbb   : > { %v387_v30 = vmax.f32 %v383_v28, 0.0  ;;  %v388_v31 = vmax.f32 %v384_v29, 0.0  ;;  %v389_v32 = vmax.f32 %v385_v26, 0.0  ;;  %v390_v33 = vmax.f32 %v386_v27, 0.0  ;;  %v4478_v49 = vpop.permute.xlu1 %765 }
  0xbd   : > { %v397_v34 = vcombine.high %v387_v30, %v387_v30  ;;  %v398_v35 = vcombine.high %v388_v31, %v388_v31  ;;  %v399_v37 = vcombine.high %v389_v32, %v389_v32  ;;  %v400_v38 = vcombine.high %v390_v33, %v390_v33 }
  0xbf   : > { %4013 = vmatprep.subr.msk.mxu0 %vm408_vm0, %v397_v34  ;;  %4017 = vmatprep.subr.msk.mxu1 %vm408_vm0, %v398_v35 }
  0xc0   : > { %4014 = vmatpush1.msk.msra.mxu0 %vm408_vm0, %v387_v30  ;;  %4018 = vmatpush1.msk.msra.mxu1 %vm408_vm0, %v388_v31 }
  0xc1   : > { %4015 = vmatmul.mubr.msk.f32.vlgmr.msra.gmra.mxu0 %vm401_vm1, %v391_v36  ;;  %4019 = vmatmul.mubr.msk.f32.vlgmr.msra.gmra.mxu1 %vm401_vm1, %v391_v36 }
  0xc2   : > { %4021 = vmatprep.subr.msk.mxu0 %vm408_vm0, %v399_v37  ;;  %4025 = vmatprep.subr.msk.mxu1 %vm408_vm0, %v400_v38  ;;  %v825_v38 = vsub.s32 4, %v4428_v12 }
  0xc3   : > { %4022 = vmatpush1.msk.msra.mxu0 %vm408_vm0, %v389_v32  ;;  %4026 = vmatpush1.msk.msra.mxu1 %vm408_vm0, %v390_v33 }
  0xc4   : > { %495 = vmatprep.mubr.f32.mxu0 %v4236_v4  ;;  %572 = vmatprep.mubr.f32.mxu1 %v4236_v4 }
  0xc5   : > { %4016 = vmatmul.mubr.msk.f32.gmra.mxu0 %vm401_vm1, %v392_v39  ;;  %4020 = vmatmul.mubr.msk.f32.gmra.mxu1 %vm401_vm1, %v392_v39 }
  0xc6   : > { %643 = vmatprep.mubr.f32.mxu0 %v4236_v4  ;;  %720 = vmatprep.mubr.f32.mxu1 %v4236_v4 }
  0xc9   : > { %4023 = vmatmul.mubr.msk.f32.vlgmr.msra.gmra.mxu0 %vm401_vm1, %v391_v36  ;;  %4027 = vmatmul.mubr.msk.f32.vlgmr.msra.gmra.mxu1 %vm401_vm1, %v391_v36 }
  0xca   : > { %649 = vmatprep.mubr.f32.mxu0 %v4236_v4  ;;  %726 = vmatprep.mubr.f32.mxu1 %v4236_v4 }
  0xcd   : > { %4024 = vmatmul.mubr.msk.f32.gmra.mxu0 %vm401_vm1, %v392_v39  ;;  %4028 = vmatmul.mubr.msk.f32.gmra.mxu1 %vm401_vm1, %v392_v39 }
  0xce   : > { %1134 = vmatprep.mubr.f32.mxu0 %v4236_v4  ;;  %1205 = vmatprep.mubr.f32.mxu1 %v4236_v4 }
 0x181   : > { %v491_v44 = vpop.f32.mrf.mxu0  ;;  %v568_v46 = vpop.f32.mrf.mxu1 }
 0x182   : > { %v745_v47 = vmul.f32 %v4467_v41, %v491_v44  ;;  %v747_v48 = vmul.f32 %v4467_v41, %v568_v46 }
 0x183   : > { %v493_v50 = vpop.f32.mrf.mxu0  ;;  %v570_v56 = vpop.f32.mrf.mxu1 }
 0x184   : > { %v773_v51 = vadd.f32 %v4478_v49, %v745_v47  ;;  %v775_v53 = vadd.f32 %v4478_v49, %v747_v48  ;;  %v746_v55 = vmul.f32 %v4467_v41, %v493_v50  ;;  %v748_v2 = vmul.f32 %v4467_v41, %v570_v56 }
 0x185   : > { %v497_v57 = vpop.f32.mrf.mxu0  ;;  %v574_v5 = vpop.f32.mrf.mxu1  ;;  %v826_v48 = vrot.slane %v4474_v45, %v825_v38 }
 0x186   : > { %v789_v58 = vmax.f32 %v773_v51, 0.0  ;;  %v791_v59 = vmax.f32 %v775_v53, 0.0  ;;  %v753_v60 = vmul.f32 %v4465_v40, %v497_v57  ;;  %v774_v0 = vadd.f32 %v4478_v49, %v746_v55 }
 0x187   : > { %v499_v6 = vpop.f32.mrf.mxu0  ;;  %v776_v13 = vadd.f32 %v4478_v49, %v748_v2  ;;  %v576_v15 = vpop.f32.mrf.mxu1  ;;  %v755_v25 = vmul.f32 %v4465_v40, %v574_v5  ;;  %v837_v51 = vsub.s32 7, %v4428_v12  ;;  %v830_v53 = vrot.slane %v4474_v45, %v829_v43 }
 0x188   : > { %v4488_v62 = vmul.f32 %v810_v52, %v789_v58  ;;  %v4490_v63 = vmul.f32 %v818_v54, %v791_v59  ;;  %v781_v3 = vadd.f32 %v4486_v61, %v753_v60  ;;  %v754_v8 = vmul.f32 %v4465_v40, %v499_v6 }
 0x189   : > { %v790_v9 = vmax.f32 %v774_v0, 0.0  ;;  %v756_v18 = vmul.f32 %v4465_v40, %v576_v15  ;;  %v792_v20 = vmax.f32 %v776_v13, 0.0  ;;  %v645_v26 = vpop.f32.mrf.mxu0  ;;  %v783_v29 = vadd.f32 %v4486_v61, %v755_v25  ;;  %v722_v30 = vpop.f32.mrf.mxu1 }
 0x18a   : > { %954 = vrot.lane.b32.xlu0 %v4490_v63, %s4238_s27  ;;  %946 = vrot.lane.b32.xlu1 %v4488_v62, %s4238_s27  ;;  %v797_v7 = vmax.f32 %v781_v3, 0.0  ;;  %v782_v17 = vadd.f32 %v4486_v61, %v754_v8  ;;  %v749_v33 = vmul.f32 %v4467_v41, %v645_v26  ;;  %v751_v50 = vmul.f32 %v4467_v41, %v722_v30 }
 0x18b   : > { %v4512_v19 = vmul.f32 %v814_v11, %v790_v9  ;;  %v784_v23 = vadd.f32 %v4486_v61, %v756_v18  ;;  %v4520_v24 = vmul.f32 %v822_v21, %v792_v20  ;;  %v647_v31 = vpop.f32.mrf.mxu0  ;;  %v799_v34 = vmax.f32 %v783_v29, 0.0  ;;  %v724_v36 = vpop.f32.mrf.mxu1 }
 0x18c   : > { %v4508_v16 = vmul.f32 %v810_v52, %v797_v7  ;;  %v798_v22 = vmax.f32 %v782_v17, 0.0  ;;  %v750_v35 = vmul.f32 %v4467_v41, %v647_v31  ;;  %v777_v37 = vadd.f32 %v4478_v49, %v749_v33 }
 0x18d   : > { %v800_v28 = vmax.f32 %v784_v23, 0.0  ;;  %v4544_v39 = vmul.f32 %v818_v54, %v799_v34  ;;  %v752_v44 = vmul.f32 %v4467_v41, %v724_v36  ;;  %v651_v46 = vpop.f32.mrf.mxu0  ;;  %v728_v56 = vpop.f32.mrf.mxu1  ;;  %v779_v41 = vadd.f32 %v4478_v49, %v751_v50 }
 0x18e   : > { %887 = vrot.lane.b32.xlu0 %v4490_v63, %s4239_s20  ;;  %879 = vrot.lane.b32.xlu1 %v4488_v62, %s4239_s20  ;;  %v4527_v27 = vmul.f32 %v814_v11, %v798_v22  ;;  %v778_v42 = vadd.f32 %v4478_v49, %v750_v35  ;;  %v793_v47 = vmax.f32 %v777_v37, 0.0  ;;  %v757_v55 = vmul.f32 %v4465_v40, %v651_v46 }
 0x18f   : > { %v4534_v32 = vmul.f32 %v822_v21, %v800_v28  ;;  %v780_v54 = vadd.f32 %v4478_v49, %v752_v44  ;;  %v653_v57 = vpop.f32.mrf.mxu0  ;;  %v833_v59 = vsub.s32 6, %v4428_v12  ;;  %v838_v2 = vrot.slane %v4474_v45, %v837_v51  ;;  %v730_v5 = vpop.f32.mrf.mxu1 }
 0x190   : > { %v794_v52 = vmax.f32 %v778_v42, 0.0  ;;  %v4563_v58 = vmul.f32 %v826_v48, %v793_v47  ;;  %v758_v60 = vmul.f32 %v4465_v40, %v653_v57  ;;  %v785_v3 = vadd.f32 %v4486_v61, %v757_v55 }
 0x191   : > { %v796_v1 = vmax.f32 %v780_v54, 0.0  ;;  %v795_v6 = vmax.f32 %v779_v41, 0.0  ;;  %v834_v49 = vrot.slane %v4474_v45, %v833_v59  ;;  %v760_v7 = vmul.f32 %v4465_v40, %v730_v5  ;;  %v4692_v41 = vld [vmem:[%s5563_s7] sm:$0xff] }
 0x192   : > { %948 = vrot.lane.b32.xlu0 %v4508_v16, %s4238_s27  ;;  %950 = vrot.lane.b32.xlu1 %v4512_v19, %s4238_s27  ;;  %v4568_v0 = vmul.f32 %v830_v53, %v794_v52  ;;  %v786_v12 = vadd.f32 %v4486_v61, %v758_v60  ;;  %v801_v9 = vmax.f32 %v785_v3, 0.0  ;;  %v759_v45 = vmul.f32 %v4465_v40, %v728_v56 }
 0x193   : > { %v4579_v8 = vmul.f32 %v838_v2, %v796_v1  ;;  %v4585_v11 = vmul.f32 %v834_v49, %v795_v6  ;;  %v788_v14 = vadd.f32 %v4486_v61, %v760_v7  ;;  %v4636_v37 = vand.u32 127, %v361_v10 }
 0x194   : > { %v802_v13 = vmax.f32 %v786_v12, 0.0  ;;  %v4588_v15 = vmul.f32 %v826_v48, %v801_v9  ;;  %v787_v20 = vadd.f32 %v4486_v61, %v759_v45  ;;  %v1060_v61 = vld [vmem:[%s5564_s8] sm:$0xff] }
 0x195   : > { %v804_v18 = vmax.f32 %v788_v14, 0.0  ;;  %vm978_vm2 = vcmp.lt.s32.totalorder %v4636_v37, 126  ;;  %vm913_vm3 = vcmp.lt.s32.totalorder %v4636_v37, 127  ;;  %vm1658_vm5 = vcmp.lt.s32.totalorder %v4636_v37, 118 }
 0x196   : > { %881 = vrot.lane.b32.xlu0 %v4508_v16, %s4239_s20  ;;  %958 = vrot.lane.b32.xlu1 %v4520_v24, %s4238_s27  ;;  %v4595_v17 = vmul.f32 %v830_v53, %v802_v13  ;;  %v803_v40 = vmax.f32 %v787_v20, 0.0  ;;  %vm1978_vm6 = vcmp.lt.s32.totalorder %v4636_v37, 108  ;;  %vm2298_vm7 = vcmp.lt.s32.totalorder %v4636_v37, 28 }
 0x197   : > { %v4602_v21 = vmul.f32 %v838_v2, %v804_v18  ;;  %vm2618_vm8 = vcmp.lt.s32.totalorder %v4636_v37, 18  ;;  %vm2938_vm9 = vcmp.lt.s32.totalorder %v4636_v37, 8  ;;  %vm3258_vm10 = vcmp.lt.s32.totalorder %v4636_v37, 56 }
 0x198   : > { %v4608_v22 = vmul.f32 %v834_v49, %v803_v40  ;;  %vm3578_vm11 = vcmp.lt.s32.totalorder %v4636_v37, 46  ;;  %vm3898_vm12 = vcmp.lt.s32.totalorder %v4636_v37, 36 }
 0x19a   : > { %952 = vrot.lane.b32.xlu0 %v4527_v27, %s4238_s27  ;;  %883 = vrot.lane.b32.xlu1 %v4512_v19, %s4239_s20 }
 0x19e   : > { %960 = vrot.lane.b32.xlu0 %v4534_v32, %s4238_s27  ;;  %891 = vrot.lane.b32.xlu1 %v4520_v24, %s4239_s20 }
 0x1a2   : > { %885 = vrot.lane.b32.xlu0 %v4527_v27, %s4239_s20  ;;  %956 = vrot.lane.b32.xlu1 %v4544_v39, %s4238_s27 }
 0x1a6   : > { %893 = vrot.lane.b32.xlu0 %v4534_v32, %s4239_s20  ;;  %889 = vrot.lane.b32.xlu1 %v4544_v39, %s4239_s20 }
 0x1aa   : > { %962 = vrot.lane.b32.xlu0 %v4563_v58, %s4238_s27  ;;  %966 = vrot.lane.b32.xlu1 %v4568_v0, %s4238_s27 }
 0x1ae   : > { %895 = vrot.lane.b32.xlu0 %v4563_v58, %s4239_s20  ;;  %974 = vrot.lane.b32.xlu1 %v4579_v8, %s4238_s27 }
 0x1b2   : > { %970 = vrot.lane.b32.xlu0 %v4585_v11, %s4238_s27  ;;  %964 = vrot.lane.b32.xlu1 %v4588_v15, %s4238_s27 }
 0x1b6   : > { %968 = vrot.lane.b32.xlu0 %v4595_v17, %s4238_s27  ;;  %897 = vrot.lane.b32.xlu1 %v4588_v15, %s4239_s20 }
 0x1ba   : > { %976 = vrot.lane.b32.xlu0 %v4602_v21, %s4238_s27  ;;  %899 = vrot.lane.b32.xlu1 %v4568_v0, %s4239_s20 }
 0x1be   : > { %901 = vrot.lane.b32.xlu0 %v4595_v17, %s4239_s20  ;;  %972 = vrot.lane.b32.xlu1 %v4608_v22, %s4238_s27  ;;  %s4244_s27 = smov 8  }
 0x1c2   : > { %909 = vrot.lane.b32.xlu0 %v4602_v21, %s4239_s20  ;;  %905 = vrot.lane.b32.xlu1 %v4608_v22, %s4239_s20 }
 0x1c6   : > { %903 = vrot.lane.b32.xlu0 %v4585_v11, %s4239_s20  ;;  %907 = vrot.lane.b32.xlu1 %v4579_v8, %s4239_s20  ;;  %s4245_s20 = smov 56  }
 0x1ca   : > { %1063 = vperm.xlu0 %4138, %v1060_v61  }
 0x1fc   : > { %v955_v23 = vpop.permute.xlu0 %954  ;;  %v4625_v25 = vpop.permute.xlu1 %946 }
 0x200   : > { %v4627_v26 = vpop.permute.xlu0 %887  ;;  %v4629_v28 = vpop.permute.xlu1 %879 }
 0x204   : > { %v4631_v29 = vpop.permute.xlu0 %948  ;;  %v951_v30 = vpop.permute.xlu1 %950 }
 0x205   : > { %v4651_v10 = vsel %vm978_vm2, %v951_v30, %v955_v23  ;;  %v4657_v48 = vsel %vm978_vm2, %v4625_v25, %v951_v30 }
 0x208   : > { %v4633_v31 = vpop.permute.xlu0 %881  ;;  %v959_v33 = vpop.permute.xlu1 %958 }
 0x209   : > { %v4715_v49 = vsel %vm978_vm2, %v955_v23, %v959_v33 }
 0x20c   : > { %v953_v34 = vpop.permute.xlu0 %952  ;;  %v884_v35 = vpop.permute.xlu1 %883 }
 0x20d   : > { %v4646_v46 = vsel %vm978_vm2, %v4631_v29, %v953_v34  ;;  %v4675_v53 = vsel %vm913_vm3, %v884_v35, %v4627_v26  ;;  %v4681_v55 = vsel %vm913_vm3, %v4629_v28, %v884_v35 }
 0x210   : > { %v961_v36 = vpop.permute.xlu0 %960  ;;  %v892_v38 = vpop.permute.xlu1 %891 }
 0x211   : > { %v4737_v45 = vsel %vm913_vm3, %v4627_v26, %v892_v38 }
 0x214   : > { %v886_v42 = vpop.permute.xlu0 %885  ;;  %v957_v43 = vpop.permute.xlu1 %956 }
 0x215   : > { %v4641_v44 = vsel %vm978_vm2, %v953_v34, %v957_v43  ;;  %v4669_v52 = vsel %vm913_vm3, %v4633_v31, %v886_v42  ;;  %v4705_v3 = vsel %vm978_vm2, %v957_v43, %v961_v36 }
 0x216   : > { %1090 = vmatprep.subr.mxu0 %v4641_v44 }
 0x217   : > { %1091 = vmatpush1.msra.mxu0 %v4646_v46 }
 0x218   : > { %v894_v47 = vpop.permute.xlu0 %893  ;;  %v890_v50 = vpop.permute.xlu1 %889  ;;  %1092 = vmatprep.subr.mxu0 %v4651_v10 }
 0x219   : > { %v4663_v51 = vsel %vm913_vm3, %v886_v42, %v890_v50  ;;  %1093 = vmatpush1.msra.mxu0 %v4657_v48  ;;  %v4725_v9 = vsel %vm913_vm3, %v890_v50, %v894_v47 }
 0x21a   : > { %1094 = vmatprep.subr.mxu0 %v4663_v51 }
 0x21b   : > { %1095 = vmatpush1.msra.mxu0 %v4669_v52 }
 0x21c   : > { %v963_v54 = vpop.permute.xlu0 %962  ;;  %1096 = vmatprep.subr.mxu0 %v4675_v53  ;;  %v967_v56 = vpop.permute.xlu1 %966 }
 0x21d   : > { %1097 = vmatpush1.msra.mxu0 %v4681_v55  ;;  %v4710_v5 = vsel %vm978_vm2, %v959_v33, %v963_v54  ;;  %v4773_v35 = vsel %vm978_vm2, %v963_v54, %v967_v56 }
 0x21e   : > { %1098 = vmatprep.subr.mxu0 %v4527_v27 }
 0x21f   : > { %1099 = vmatpush1.msra.mxu0 %v4508_v16 }
 0x220   : > { %v4687_v57 = vpop.permute.xlu0 %895  ;;  %1100 = vmatprep.subr.mxu0 %v4512_v19  ;;  %v975_v59 = vpop.permute.xlu1 %974 }
 0x221   : > { %1101 = vmatpush1.msra.mxu0 %v4488_v62  ;;  %v4731_v13 = vsel %vm913_vm3, %v892_v38, %v4687_v57 }
 0x222   : > { %4029 = vmatmul.mubr.msk.f32.vlgmr.msra.gmra.mxu0 %vm1066_vm4, %v4692_v41 }
 0x223   : > { %1276 = vmatprep.mubr.f32.mxu0 %v4236_v4 }
 0x224   : > { %v971_v60 = vpop.permute.xlu0 %970  ;;  %v965_v1 = vpop.permute.xlu1 %964 }
 0x225   : > { %v4701_v2 = vsel %vm978_vm2, %v961_v36, %v965_v1  ;;  %v4767_v33 = vsel %vm978_vm2, %v967_v56, %v971_v60  ;;  %v4789_v42 = vsel %vm978_vm2, %v971_v60, %v975_v59 }
 0x226   : > { %1161 = vmatprep.subr.mxu1 %v4701_v2 }
 0x227   : > { %1162 = vmatpush1.msra.mxu1 %v4705_v3 }
 0x228   : > { %v969_v6 = vpop.permute.xlu0 %968  ;;  %1163 = vmatprep.subr.mxu1 %v4710_v5  ;;  %v898_v12 = vpop.permute.xlu1 %897 }
 0x229   : > { %v4720_v7 = vsel %vm913_vm3, %v894_v47, %v898_v12  ;;  %1164 = vmatpush1.msra.mxu1 %v4715_v49  ;;  %v4755_v26 = vsel %vm978_vm2, %v965_v1, %v969_v6  ;;  %v4048_v1 = vld [vmem:[%s5563_s7 + $0x20] sm:$0xff] }
 0x22a   : > { %1165 = vmatprep.subr.mxu1 %v4720_v7 }
 0x22b   : > { %1166 = vmatpush1.msra.mxu1 %v4725_v9 }
 0x22c   : > { %v977_v14 = vpop.permute.xlu0 %976  ;;  %1167 = vmatprep.subr.mxu1 %v4731_v13  ;;  %v900_v18 = vpop.permute.xlu1 %899 }
 0x22d   : > { %1168 = vmatpush1.msra.mxu1 %v4737_v45  ;;  %v4760_v30 = vsel %vm978_vm2, %v977_v14, %v4631_v29  ;;  %v4778_v29 = vsel %vm978_vm2, %v975_v59, %v4625_v25  ;;  %v4818_v56 = vsel %vm913_vm3, %v4687_v57, %v900_v18  ;;  %v4038_v57 = vld [vmem:[%s5563_s7 + $0x10] sm:$0xff] }
 0x22e   : > { %1169 = vmatprep.subr.mxu1 %v4534_v32 }
 0x22f   : > { %1170 = vmatpush1.msra.mxu1 %v4544_v39 }
 0x230   : > { %v902_v20 = vpop.permute.xlu0 %901  ;;  %1171 = vmatprep.subr.mxu1 %v4520_v24  ;;  %v973_v40 = vpop.permute.xlu1 %972 }
 0x231   : > { %v4746_v61 = vsel %vm978_vm2, %v973_v40, %v977_v14  ;;  %v4750_v23 = vsel %vm978_vm2, %v969_v6, %v973_v40  ;;  %1172 = vmatpush1.msra.mxu1 %v4490_v63  ;;  %v4053_v6 = vld [vmem:[%s5563_s7 + $0x28] sm:$0xff]  ;;  %v4063_v14 = vld [vmem:[%s5563_s7 + $0x38] sm:$0xff] }
 0x232   : > { %4030 = vmatmul.mubr.msk.f32.vlgmr.msra.gmra.mxu1 %vm1066_vm4, %v4692_v41  ;;  %1232 = vmatprep.subr.mxu0 %v4750_v23 }
 0x233   : > { %1303 = vmatprep.subr.mxu1 %v4760_v30  ;;  %1233 = vmatpush1.msra.mxu0 %v4755_v26 }
 0x234   : > { %v910_v34 = vpop.permute.xlu0 %909  ;;  %1304 = vmatpush1.msra.mxu1 %v4746_v61  ;;  %v906_v36 = vpop.permute.xlu1 %905  ;;  %1234 = vmatprep.subr.mxu0 %v4767_v33 }
 0x235   : > { %v4785_v38 = vsel %vm913_vm3, %v910_v34, %v4633_v31  ;;  %v4793_v43 = vsel %vm913_vm3, %v902_v20, %v906_v36  ;;  %1305 = vmatprep.subr.mxu1 %v4778_v29  ;;  %v4798_v25 = vsel %vm913_vm3, %v906_v36, %v910_v34  ;;  %1235 = vmatpush1.msra.mxu0 %v4773_v35 }
 0x236   : > { %v4803_v31 = vsel %vm913_vm3, %v898_v12, %v902_v20  ;;  %1306 = vmatpush1.msra.mxu1 %v4789_v42  ;;  %1236 = vmatprep.subr.mxu0 %v4793_v43  ;;  %v4058_v12 = vld [vmem:[%s5563_s7 + $0x30] sm:$0xff] }
 0x237   : > { %1307 = vmatprep.subr.mxu1 %v4785_v38  ;;  %1237 = vmatpush1.msra.mxu0 %v4803_v31 }
 0x238   : > { %v904_v47 = vpop.permute.xlu0 %903  ;;  %1308 = vmatpush1.msra.mxu1 %v4798_v25  ;;  %v908_v50 = vpop.permute.xlu1 %907  ;;  %1347 = vmatprep.mubr.f32.mxu1 %v4236_v4 }
 0x239   : > { %v4812_v54 = vsel %vm913_vm3, %v900_v18, %v904_v47  ;;  %v4823_v59 = vsel %vm913_vm3, %v908_v50, %v4629_v28  ;;  %v4827_v60 = vsel %vm913_vm3, %v904_v47, %v908_v50  ;;  %v4033_v28 = vld [vmem:[%s5563_s7 + $0x8] sm:$0xff] }
 0x23a   : > { %1238 = vmatprep.subr.mxu0 %v4812_v54  ;;  %1309 = vmatprep.subr.mxu1 %v4823_v59 }
 0x23b   : > { %1239 = vmatpush1.msra.mxu0 %v4818_v56  ;;  %1310 = vmatpush1.msra.mxu1 %v4827_v60 }
 0x23c   : > { %1240 = vmatprep.subr.mxu0 %v4595_v17  ;;  %1311 = vmatprep.subr.mxu1 %v4602_v21 }
 0x23d   : > { %1241 = vmatpush1.msra.mxu0 %v4588_v15  ;;  %1312 = vmatpush1.msra.mxu1 %v4608_v22 }
 0x23e   : > { %1242 = vmatprep.subr.mxu0 %v4568_v0  ;;  %1313 = vmatprep.subr.mxu1 %v4579_v8 }
 0x23f   : > { %1243 = vmatpush1.msra.mxu0 %v4563_v58  ;;  %1314 = vmatpush1.msra.mxu1 %v4585_v11 }
 0x240   : > { %4031 = vmatmul.mubr.msk.f32.vlgmr.msra.gmra.mxu0 %vm1066_vm4, %v4692_v41  ;;  %4032 = vmatmul.mubr.msk.f32.vlgmr.msra.gmra.mxu1 %vm1066_vm4, %v4692_v41  ;;  %v4043_v41 = vld [vmem:[%s5563_s7 + $0x18] sm:$0xff] }
 0x241   : > { %1378 = vmatprep.subr.mxu0 %v4641_v44  ;;  %1449 = vmatprep.subr.mxu1 %v4701_v2 }
 0x242   : > { %1379 = vmatpush1.msra.mxu0 %v4646_v46  ;;  %1450 = vmatpush1.msra.mxu1 %v4705_v3 }
 0x243   : > { %1380 = vmatprep.subr.mxu0 %v4651_v10  ;;  %1451 = vmatprep.subr.mxu1 %v4710_v5 }
 0x244   : > { %1381 = vmatpush1.msra.mxu0 %v4657_v48  ;;  %1452 = vmatpush1.msra.mxu1 %v4715_v49 }
 0x245   : > { %1382 = vmatprep.subr.mxu0 %v4663_v51  ;;  %1453 = vmatprep.subr.mxu1 %v4720_v7 }
 0x246   : > { %1383 = vmatpush1.msra.mxu0 %v4669_v52  ;;  %1454 = vmatpush1.msra.mxu1 %v4725_v9 }
 0x247   : > { %1384 = vmatprep.subr.mxu0 %v4675_v53  ;;  %1455 = vmatprep.subr.mxu1 %v4731_v13 }
 0x248   : > { %1385 = vmatpush1.msra.mxu0 %v4681_v55  ;;  %1456 = vmatpush1.msra.mxu1 %v4737_v45 }
 0x249   : > { %1386 = vmatprep.subr.mxu0 %v4527_v27  ;;  %1457 = vmatprep.subr.mxu1 %v4534_v32 }
 0x24a   : > { %1387 = vmatpush1.msra.mxu0 %v4508_v16  ;;  %1458 = vmatpush1.msra.mxu1 %v4544_v39 }
 0x24b   : > { %1388 = vmatprep.subr.mxu0 %v4512_v19  ;;  %1459 = vmatprep.subr.mxu1 %v4520_v24 }
 0x24c   : > { %1389 = vmatpush1.msra.mxu0 %v4488_v62  ;;  %1422 = vmatprep.mubr.f32.mxu0 %v4236_v4 }
 0x24d   : > { %1460 = vmatpush1.msra.mxu1 %v4490_v63  ;;  %4034 = vmatmul.mubr.msk.f32.vlgmr.msra.gmra.mxu0 %vm1066_vm4, %v4033_v28 }
 0x24e   : > { %1493 = vmatprep.mubr.f32.mxu1 %v4236_v4  ;;  %1520 = vmatprep.subr.mxu0 %v4750_v23 }
 0x24f   : > { %1591 = vmatprep.subr.mxu1 %v4760_v30  ;;  %4035 = vmatmul.mubr.msk.f32.vlgmr.msra.gmra.mxu1 %vm1066_vm4, %v4033_v28 }
 0x250   : > { %1521 = vmatpush1.msra.mxu0 %v4755_v26  ;;  %1592 = vmatpush1.msra.mxu1 %v4746_v61 }
 0x251   : > { %1522 = vmatprep.subr.mxu0 %v4767_v33  ;;  %1593 = vmatprep.subr.mxu1 %v4778_v29 }
 0x252   : > { %1523 = vmatpush1.msra.mxu0 %v4773_v35  ;;  %1594 = vmatpush1.msra.mxu1 %v4789_v42 }
 0x253   : > { %1524 = vmatprep.subr.mxu0 %v4793_v43  ;;  %1595 = vmatprep.subr.mxu1 %v4785_v38 }
 0x254   : > { %1525 = vmatpush1.msra.mxu0 %v4803_v31  ;;  %1596 = vmatpush1.msra.mxu1 %v4798_v25 }
 0x255   : > { %1526 = vmatprep.subr.mxu0 %v4812_v54  ;;  %1597 = vmatprep.subr.mxu1 %v4823_v59 }
 0x256   : > { %1527 = vmatpush1.msra.mxu0 %v4818_v56  ;;  %1598 = vmatpush1.msra.mxu1 %v4827_v60 }
 0x257   : > { %1528 = vmatprep.subr.mxu0 %v4595_v17  ;;  %1599 = vmatprep.subr.mxu1 %v4602_v21 }
 0x258   : > { %1529 = vmatpush1.msra.mxu0 %v4588_v15  ;;  %1600 = vmatpush1.msra.mxu1 %v4608_v22 }
 0x259   : > { %1530 = vmatprep.subr.mxu0 %v4568_v0  ;;  %1601 = vmatprep.subr.mxu1 %v4579_v8 }
 0x25a   : > { %1531 = vmatpush1.msra.mxu0 %v4563_v58  ;;  %1564 = vmatprep.mubr.f32.mxu0 %v4236_v4 }
 0x25b   : > { %1602 = vmatpush1.msra.mxu1 %v4585_v11  ;;  %4036 = vmatmul.mubr.msk.f32.vlgmr.msra.gmra.mxu0 %vm1066_vm4, %v4033_v28 }
 0x25c   : > { %1635 = vmatprep.mubr.f32.mxu1 %v4236_v4  ;;  %1698 = vmatprep.subr.mxu0 %v4641_v44 }
 0x25d   : > { %1769 = vmatprep.subr.mxu1 %v4701_v2  ;;  %4037 = vmatmul.mubr.msk.f32.vlgmr.msra.gmra.mxu1 %vm1066_vm4, %v4033_v28 }
 0x25e   : > { %1699 = vmatpush1.msra.mxu0 %v4646_v46  ;;  %1770 = vmatpush1.msra.mxu1 %v4705_v3 }
 0x25f   : > { %1700 = vmatprep.subr.mxu0 %v4651_v10  ;;  %1771 = vmatprep.subr.mxu1 %v4710_v5 }
 0x260   : > { %1701 = vmatpush1.msra.mxu0 %v4657_v48  ;;  %1772 = vmatpush1.msra.mxu1 %v4715_v49 }
 0x261   : > { %1702 = vmatprep.subr.mxu0 %v4663_v51  ;;  %1773 = vmatprep.subr.mxu1 %v4720_v7 }
 0x262   : > { %1703 = vmatpush1.msra.mxu0 %v4669_v52  ;;  %1774 = vmatpush1.msra.mxu1 %v4725_v9 }
 0x263   : > { %1704 = vmatprep.subr.mxu0 %v4675_v53  ;;  %1775 = vmatprep.subr.mxu1 %v4731_v13 }
 0x264   : > { %1705 = vmatpush1.msra.mxu0 %v4681_v55  ;;  %1776 = vmatpush1.msra.mxu1 %v4737_v45 }
 0x265   : > { %1706 = vmatprep.subr.mxu0 %v4527_v27  ;;  %1777 = vmatprep.subr.mxu1 %v4534_v32 }
 0x266   : > { %1707 = vmatpush1.msra.mxu0 %v4508_v16  ;;  %1778 = vmatpush1.msra.mxu1 %v4544_v39 }
 0x267   : > { %1708 = vmatprep.subr.mxu0 %v4512_v19  ;;  %1779 = vmatprep.subr.mxu1 %v4520_v24 }
 0x268   : > { %1709 = vmatpush1.msra.mxu0 %v4488_v62  ;;  %1742 = vmatprep.mubr.f32.mxu0 %v4236_v4 }
 0x269   : > { %1780 = vmatpush1.msra.mxu1 %v4490_v63  ;;  %4039 = vmatmul.mubr.msk.f32.vlgmr.msra.gmra.mxu0 %vm1066_vm4, %v4038_v57 }
 0x26a   : > { %1813 = vmatprep.mubr.f32.mxu1 %v4236_v4  ;;  %1840 = vmatprep.subr.mxu0 %v4750_v23 }
 0x26b   : > { %1911 = vmatprep.subr.mxu1 %v4760_v30  ;;  %4040 = vmatmul.mubr.msk.f32.vlgmr.msra.gmra.mxu1 %vm1066_vm4, %v4038_v57 }
 0x26c   : > { %1841 = vmatpush1.msra.mxu0 %v4755_v26  ;;  %1912 = vmatpush1.msra.mxu1 %v4746_v61 }
 0x26d   : > { %1842 = vmatprep.subr.mxu0 %v4767_v33  ;;  %1913 = vmatprep.subr.mxu1 %v4778_v29 }
 0x26e   : > { %1843 = vmatpush1.msra.mxu0 %v4773_v35  ;;  %1914 = vmatpush1.msra.mxu1 %v4789_v42 }
 0x26f   : > { %1844 = vmatprep.subr.mxu0 %v4793_v43  ;;  %1915 = vmatprep.subr.mxu1 %v4785_v38 }
 0x270   : > { %1845 = vmatpush1.msra.mxu0 %v4803_v31  ;;  %1916 = vmatpush1.msra.mxu1 %v4798_v25 }
 0x271   : > { %1846 = vmatprep.subr.mxu0 %v4812_v54  ;;  %1917 = vmatprep.subr.mxu1 %v4823_v59 }
 0x272   : > { %1847 = vmatpush1.msra.mxu0 %v4818_v56  ;;  %1918 = vmatpush1.msra.mxu1 %v4827_v60 }
 0x273   : > { %1848 = vmatprep.subr.mxu0 %v4595_v17  ;;  %1919 = vmatprep.subr.mxu1 %v4602_v21 }
 0x274   : > { %1849 = vmatpush1.msra.mxu0 %v4588_v15  ;;  %1920 = vmatpush1.msra.mxu1 %v4608_v22 }
 0x275   : > { %1850 = vmatprep.subr.mxu0 %v4568_v0  ;;  %1921 = vmatprep.subr.mxu1 %v4579_v8 }
 0x276   : > { %1851 = vmatpush1.msra.mxu0 %v4563_v58  ;;  %1884 = vmatprep.mubr.f32.mxu0 %v4236_v4 }
 0x277   : > { %1922 = vmatpush1.msra.mxu1 %v4585_v11  ;;  %4041 = vmatmul.mubr.msk.f32.vlgmr.msra.gmra.mxu0 %vm1066_vm4, %v4038_v57 }
 0x278   : > { %1955 = vmatprep.mubr.f32.mxu1 %v4236_v4  ;;  %2018 = vmatprep.subr.mxu0 %v4641_v44 }
 0x279   : > { %2089 = vmatprep.subr.mxu1 %v4701_v2  ;;  %4042 = vmatmul.mubr.msk.f32.vlgmr.msra.gmra.mxu1 %vm1066_vm4, %v4038_v57 }
 0x27a   : > { %2019 = vmatpush1.msra.mxu0 %v4646_v46  ;;  %2090 = vmatpush1.msra.mxu1 %v4705_v3 }
 0x27b   : > { %2020 = vmatprep.subr.mxu0 %v4651_v10  ;;  %2091 = vmatprep.subr.mxu1 %v4710_v5 }
 0x27c   : > { %2021 = vmatpush1.msra.mxu0 %v4657_v48  ;;  %2092 = vmatpush1.msra.mxu1 %v4715_v49 }
 0x27d   : > { %2022 = vmatprep.subr.mxu0 %v4663_v51  ;;  %2093 = vmatprep.subr.mxu1 %v4720_v7 }
 0x27e   : > { %2023 = vmatpush1.msra.mxu0 %v4669_v52  ;;  %2094 = vmatpush1.msra.mxu1 %v4725_v9 }
 0x27f   : > { %2024 = vmatprep.subr.mxu0 %v4675_v53  ;;  %2095 = vmatprep.subr.mxu1 %v4731_v13 }
 0x280   : > { %2025 = vmatpush1.msra.mxu0 %v4681_v55  ;;  %2096 = vmatpush1.msra.mxu1 %v4737_v45 }
 0x281   : > { %2026 = vmatprep.subr.mxu0 %v4527_v27  ;;  %2097 = vmatprep.subr.mxu1 %v4534_v32 }
 0x282   : > { %2027 = vmatpush1.msra.mxu0 %v4508_v16  ;;  %2098 = vmatpush1.msra.mxu1 %v4544_v39 }
 0x283   : > { %2028 = vmatprep.subr.mxu0 %v4512_v19  ;;  %2099 = vmatprep.subr.mxu1 %v4520_v24 }
 0x284   : > { %2029 = vmatpush1.msra.mxu0 %v4488_v62  ;;  %2062 = vmatprep.mubr.f32.mxu0 %v4236_v4 }
 0x285   : > { %2100 = vmatpush1.msra.mxu1 %v4490_v63  ;;  %4044 = vmatmul.mubr.msk.f32.vlgmr.msra.gmra.mxu0 %vm1066_vm4, %v4043_v41 }
 0x286   : > { %2133 = vmatprep.mubr.f32.mxu1 %v4236_v4  ;;  %2160 = vmatprep.subr.mxu0 %v4750_v23 }
 0x287   : > { %2231 = vmatprep.subr.mxu1 %v4760_v30  ;;  %4045 = vmatmul.mubr.msk.f32.vlgmr.msra.gmra.mxu1 %vm1066_vm4, %v4043_v41 }
 0x288   : > { %2161 = vmatpush1.msra.mxu0 %v4755_v26  ;;  %2232 = vmatpush1.msra.mxu1 %v4746_v61 }
 0x289   : > { %2162 = vmatprep.subr.mxu0 %v4767_v33  ;;  %2233 = vmatprep.subr.mxu1 %v4778_v29 }
 0x28a   : > { %2163 = vmatpush1.msra.mxu0 %v4773_v35  ;;  %2234 = vmatpush1.msra.mxu1 %v4789_v42 }
 0x28b   : > { %2164 = vmatprep.subr.mxu0 %v4793_v43  ;;  %2235 = vmatprep.subr.mxu1 %v4785_v38 }
 0x28c   : > { %2165 = vmatpush1.msra.mxu0 %v4803_v31  ;;  %2236 = vmatpush1.msra.mxu1 %v4798_v25 }
 0x28d   : > { %2166 = vmatprep.subr.mxu0 %v4812_v54  ;;  %2237 = vmatprep.subr.mxu1 %v4823_v59 }
 0x28e   : > { %2167 = vmatpush1.msra.mxu0 %v4818_v56  ;;  %2238 = vmatpush1.msra.mxu1 %v4827_v60 }
 0x28f   : > { %2168 = vmatprep.subr.mxu0 %v4595_v17  ;;  %2239 = vmatprep.subr.mxu1 %v4602_v21 }
 0x290   : > { %2169 = vmatpush1.msra.mxu0 %v4588_v15  ;;  %2240 = vmatpush1.msra.mxu1 %v4608_v22 }
 0x291   : > { %2170 = vmatprep.subr.mxu0 %v4568_v0  ;;  %2241 = vmatprep.subr.mxu1 %v4579_v8 }
 0x292   : > { %2171 = vmatpush1.msra.mxu0 %v4563_v58  ;;  %2204 = vmatprep.mubr.f32.mxu0 %v4236_v4 }
 0x293   : > { %2242 = vmatpush1.msra.mxu1 %v4585_v11  ;;  %4046 = vmatmul.mubr.msk.f32.vlgmr.msra.gmra.mxu0 %vm1066_vm4, %v4043_v41 }
 0x294   : > { %2275 = vmatprep.mubr.f32.mxu1 %v4236_v4  ;;  %2338 = vmatprep.subr.mxu0 %v4641_v44 }
 0x295   : > { %2409 = vmatprep.subr.mxu1 %v4701_v2  ;;  %4047 = vmatmul.mubr.msk.f32.vlgmr.msra.gmra.mxu1 %vm1066_vm4, %v4043_v41 }
 0x296   : > { %2339 = vmatpush1.msra.mxu0 %v4646_v46  ;;  %2410 = vmatpush1.msra.mxu1 %v4705_v3 }
 0x297   : > { %2340 = vmatprep.subr.mxu0 %v4651_v10  ;;  %2411 = vmatprep.subr.mxu1 %v4710_v5 }
 0x298   : > { %2341 = vmatpush1.msra.mxu0 %v4657_v48  ;;  %2412 = vmatpush1.msra.mxu1 %v4715_v49 }
 0x299   : > { %2342 = vmatprep.subr.mxu0 %v4663_v51  ;;  %2413 = vmatprep.subr.mxu1 %v4720_v7 }
 0x29a   : > { %2343 = vmatpush1.msra.mxu0 %v4669_v52  ;;  %2414 = vmatpush1.msra.mxu1 %v4725_v9 }
 0x29b   : > { %2344 = vmatprep.subr.mxu0 %v4675_v53  ;;  %2415 = vmatprep.subr.mxu1 %v4731_v13 }
 0x29c   : > { %2345 = vmatpush1.msra.mxu0 %v4681_v55  ;;  %2416 = vmatpush1.msra.mxu1 %v4737_v45 }
 0x29d   : > { %2346 = vmatprep.subr.mxu0 %v4527_v27  ;;  %2417 = vmatprep.subr.mxu1 %v4534_v32 }
 0x29e   : > { %2347 = vmatpush1.msra.mxu0 %v4508_v16  ;;  %2418 = vmatpush1.msra.mxu1 %v4544_v39 }
 0x29f   : > { %2348 = vmatprep.subr.mxu0 %v4512_v19  ;;  %2419 = vmatprep.subr.mxu1 %v4520_v24 }
 0x2a0   : > { %2349 = vmatpush1.msra.mxu0 %v4488_v62  ;;  %2382 = vmatprep.mubr.f32.mxu0 %v4236_v4 }
 0x2a1   : > { %2420 = vmatpush1.msra.mxu1 %v4490_v63  ;;  %4049 = vmatmul.mubr.msk.f32.vlgmr.msra.gmra.mxu0 %vm1066_vm4, %v4048_v1 }
 0x2a2   : > { %2453 = vmatprep.mubr.f32.mxu1 %v4236_v4  ;;  %2480 = vmatprep.subr.mxu0 %v4750_v23 }
 0x2a3   : > { %2551 = vmatprep.subr.mxu1 %v4760_v30  ;;  %4050 = vmatmul.mubr.msk.f32.vlgmr.msra.gmra.mxu1 %vm1066_vm4, %v4048_v1 }
 0x2a4   : > { %2481 = vmatpush1.msra.mxu0 %v4755_v26  ;;  %2552 = vmatpush1.msra.mxu1 %v4746_v61 }
 0x2a5   : > { %2482 = vmatprep.subr.mxu0 %v4767_v33  ;;  %2553 = vmatprep.subr.mxu1 %v4778_v29 }
 0x2a6   : > { %2483 = vmatpush1.msra.mxu0 %v4773_v35  ;;  %2554 = vmatpush1.msra.mxu1 %v4789_v42 }
 0x2a7   : > { %2484 = vmatprep.subr.mxu0 %v4793_v43  ;;  %2555 = vmatprep.subr.mxu1 %v4785_v38 }
 0x2a8   : > { %2485 = vmatpush1.msra.mxu0 %v4803_v31  ;;  %2556 = vmatpush1.msra.mxu1 %v4798_v25 }
 0x2a9   : > { %2486 = vmatprep.subr.mxu0 %v4812_v54  ;;  %2557 = vmatprep.subr.mxu1 %v4823_v59 }
 0x2aa   : > { %2487 = vmatpush1.msra.mxu0 %v4818_v56  ;;  %2558 = vmatpush1.msra.mxu1 %v4827_v60 }
 0x2ab   : > { %2488 = vmatprep.subr.mxu0 %v4595_v17  ;;  %2559 = vmatprep.subr.mxu1 %v4602_v21 }
 0x2ac   : > { %2489 = vmatpush1.msra.mxu0 %v4588_v15  ;;  %2560 = vmatpush1.msra.mxu1 %v4608_v22 }
 0x2ad   : > { %2490 = vmatprep.subr.mxu0 %v4568_v0  ;;  %2561 = vmatprep.subr.mxu1 %v4579_v8 }
 0x2ae   : > { %2491 = vmatpush1.msra.mxu0 %v4563_v58  ;;  %2524 = vmatprep.mubr.f32.mxu0 %v4236_v4 }
 0x2af   : > { %2562 = vmatpush1.msra.mxu1 %v4585_v11  ;;  %4051 = vmatmul.mubr.msk.f32.vlgmr.msra.gmra.mxu0 %vm1066_vm4, %v4048_v1 }
 0x2b0   : > { %2595 = vmatprep.mubr.f32.mxu1 %v4236_v4  ;;  %2658 = vmatprep.subr.mxu0 %v4641_v44 }
 0x2b1   : > { %2729 = vmatprep.subr.mxu1 %v4701_v2  ;;  %4052 = vmatmul.mubr.msk.f32.vlgmr.msra.gmra.mxu1 %vm1066_vm4, %v4048_v1 }
 0x2b2   : > { %2659 = vmatpush1.msra.mxu0 %v4646_v46  ;;  %2730 = vmatpush1.msra.mxu1 %v4705_v3 }
 0x2b3   : > { %2660 = vmatprep.subr.mxu0 %v4651_v10  ;;  %2731 = vmatprep.subr.mxu1 %v4710_v5 }
 0x2b4   : > { %2661 = vmatpush1.msra.mxu0 %v4657_v48  ;;  %2732 = vmatpush1.msra.mxu1 %v4715_v49 }
 0x2b5   : > { %2662 = vmatprep.subr.mxu0 %v4663_v51  ;;  %2733 = vmatprep.subr.mxu1 %v4720_v7 }
 0x2b6   : > { %2663 = vmatpush1.msra.mxu0 %v4669_v52  ;;  %2734 = vmatpush1.msra.mxu1 %v4725_v9 }
 0x2b7   : > { %2664 = vmatprep.subr.mxu0 %v4675_v53  ;;  %2735 = vmatprep.subr.mxu1 %v4731_v13 }
 0x2b8   : > { %2665 = vmatpush1.msra.mxu0 %v4681_v55  ;;  %2736 = vmatpush1.msra.mxu1 %v4737_v45 }
 0x2b9   : > { %2666 = vmatprep.subr.mxu0 %v4527_v27  ;;  %2737 = vmatprep.subr.mxu1 %v4534_v32 }
 0x2ba   : > { %2667 = vmatpush1.msra.mxu0 %v4508_v16  ;;  %2738 = vmatpush1.msra.mxu1 %v4544_v39 }
 0x2bb   : > { %2668 = vmatprep.subr.mxu0 %v4512_v19  ;;  %2739 = vmatprep.subr.mxu1 %v4520_v24 }
 0x2bc   : > { %2669 = vmatpush1.msra.mxu0 %v4488_v62  ;;  %2702 = vmatprep.mubr.f32.mxu0 %v4236_v4 }
 0x2bd   : > { %2740 = vmatpush1.msra.mxu1 %v4490_v63  ;;  %4054 = vmatmul.mubr.msk.f32.vlgmr.msra.gmra.mxu0 %vm1066_vm4, %v4053_v6 }
 0x2be   : > { %2773 = vmatprep.mubr.f32.mxu1 %v4236_v4  ;;  %2800 = vmatprep.subr.mxu0 %v4750_v23 }
 0x2bf   : > { %2871 = vmatprep.subr.mxu1 %v4760_v30  ;;  %4055 = vmatmul.mubr.msk.f32.vlgmr.msra.gmra.mxu1 %vm1066_vm4, %v4053_v6 }
 0x2c0   : > { %2801 = vmatpush1.msra.mxu0 %v4755_v26  ;;  %2872 = vmatpush1.msra.mxu1 %v4746_v61 }
 0x2c1   : > { %2802 = vmatprep.subr.mxu0 %v4767_v33  ;;  %2873 = vmatprep.subr.mxu1 %v4778_v29 }
 0x2c2   : > { %2803 = vmatpush1.msra.mxu0 %v4773_v35  ;;  %2874 = vmatpush1.msra.mxu1 %v4789_v42 }
 0x2c3   : > { %2804 = vmatprep.subr.mxu0 %v4793_v43  ;;  %2875 = vmatprep.subr.mxu1 %v4785_v38 }
 0x2c4   : > { %2805 = vmatpush1.msra.mxu0 %v4803_v31  ;;  %2876 = vmatpush1.msra.mxu1 %v4798_v25 }
 0x2c5   : > { %2806 = vmatprep.subr.mxu0 %v4812_v54  ;;  %2877 = vmatprep.subr.mxu1 %v4823_v59 }
 0x2c6   : > { %2807 = vmatpush1.msra.mxu0 %v4818_v56  ;;  %2878 = vmatpush1.msra.mxu1 %v4827_v60 }
 0x2c7   : > { %2808 = vmatprep.subr.mxu0 %v4595_v17  ;;  %2879 = vmatprep.subr.mxu1 %v4602_v21 }
 0x2c8   : > { %2809 = vmatpush1.msra.mxu0 %v4588_v15  ;;  %2880 = vmatpush1.msra.mxu1 %v4608_v22 }
 0x2c9   : > { %2810 = vmatprep.subr.mxu0 %v4568_v0  ;;  %2881 = vmatprep.subr.mxu1 %v4579_v8 }
 0x2ca   : > { %2811 = vmatpush1.msra.mxu0 %v4563_v58  ;;  %2844 = vmatprep.mubr.f32.mxu0 %v4236_v4 }
 0x2cb   : > { %2882 = vmatpush1.msra.mxu1 %v4585_v11  ;;  %4056 = vmatmul.mubr.msk.f32.vlgmr.msra.gmra.mxu0 %vm1066_vm4, %v4053_v6 }
 0x2cc   : > { %2915 = vmatprep.mubr.f32.mxu1 %v4236_v4  ;;  %2978 = vmatprep.subr.mxu0 %v4641_v44 }
 0x2cd   : > { %3049 = vmatprep.subr.mxu1 %v4701_v2  ;;  %4057 = vmatmul.mubr.msk.f32.vlgmr.msra.gmra.mxu1 %vm1066_vm4, %v4053_v6 }
 0x2ce   : > { %2979 = vmatpush1.msra.mxu0 %v4646_v46  ;;  %3050 = vmatpush1.msra.mxu1 %v4705_v3 }
 0x2cf   : > { %2980 = vmatprep.subr.mxu0 %v4651_v10  ;;  %3051 = vmatprep.subr.mxu1 %v4710_v5 }
 0x2d0   : > { %2981 = vmatpush1.msra.mxu0 %v4657_v48  ;;  %3052 = vmatpush1.msra.mxu1 %v4715_v49 }
 0x2d1   : > { %2982 = vmatprep.subr.mxu0 %v4663_v51  ;;  %3053 = vmatprep.subr.mxu1 %v4720_v7 }
 0x2d2   : > { %2983 = vmatpush1.msra.mxu0 %v4669_v52  ;;  %3054 = vmatpush1.msra.mxu1 %v4725_v9 }
 0x2d3   : > { %2984 = vmatprep.subr.mxu0 %v4675_v53  ;;  %3055 = vmatprep.subr.mxu1 %v4731_v13 }
 0x2d4   : > { %2985 = vmatpush1.msra.mxu0 %v4681_v55  ;;  %3056 = vmatpush1.msra.mxu1 %v4737_v45 }
 0x2d5   : > { %2986 = vmatprep.subr.mxu0 %v4527_v27  ;;  %3057 = vmatprep.subr.mxu1 %v4534_v32 }
 0x2d6   : > { %2987 = vmatpush1.msra.mxu0 %v4508_v16  ;;  %3058 = vmatpush1.msra.mxu1 %v4544_v39 }
 0x2d7   : > { %2988 = vmatprep.subr.mxu0 %v4512_v19  ;;  %3059 = vmatprep.subr.mxu1 %v4520_v24 }
 0x2d8   : > { %2989 = vmatpush1.msra.mxu0 %v4488_v62  ;;  %3022 = vmatprep.mubr.f32.mxu0 %v4236_v4 }
 0x2d9   : > { %3060 = vmatpush1.msra.mxu1 %v4490_v63  ;;  %4059 = vmatmul.mubr.msk.f32.vlgmr.msra.gmra.mxu0 %vm1066_vm4, %v4058_v12 }
 0x2da   : > { %3093 = vmatprep.mubr.f32.mxu1 %v4236_v4  ;;  %3120 = vmatprep.subr.mxu0 %v4750_v23 }
 0x2db   : > { %3191 = vmatprep.subr.mxu1 %v4760_v30  ;;  %4060 = vmatmul.mubr.msk.f32.vlgmr.msra.gmra.mxu1 %vm1066_vm4, %v4058_v12 }
 0x2dc   : > { %3121 = vmatpush1.msra.mxu0 %v4755_v26  ;;  %3192 = vmatpush1.msra.mxu1 %v4746_v61 }
 0x2dd   : > { %3122 = vmatprep.subr.mxu0 %v4767_v33  ;;  %3193 = vmatprep.subr.mxu1 %v4778_v29 }
 0x2de   : > { %3123 = vmatpush1.msra.mxu0 %v4773_v35  ;;  %3194 = vmatpush1.msra.mxu1 %v4789_v42 }
 0x2df   : > { %3124 = vmatprep.subr.mxu0 %v4793_v43  ;;  %3195 = vmatprep.subr.mxu1 %v4785_v38 }
 0x2e0   : > { %3125 = vmatpush1.msra.mxu0 %v4803_v31  ;;  %3196 = vmatpush1.msra.mxu1 %v4798_v25 }
 0x2e1   : > { %3126 = vmatprep.subr.mxu0 %v4812_v54  ;;  %3197 = vmatprep.subr.mxu1 %v4823_v59 }
 0x2e2   : > { %3127 = vmatpush1.msra.mxu0 %v4818_v56  ;;  %3198 = vmatpush1.msra.mxu1 %v4827_v60 }
 0x2e3   : > { %3128 = vmatprep.subr.mxu0 %v4595_v17  ;;  %3199 = vmatprep.subr.mxu1 %v4602_v21 }
 0x2e4   : > { %3129 = vmatpush1.msra.mxu0 %v4588_v15  ;;  %3200 = vmatpush1.msra.mxu1 %v4608_v22 }
 0x2e5   : > { %3130 = vmatprep.subr.mxu0 %v4568_v0  ;;  %3201 = vmatprep.subr.mxu1 %v4579_v8 }
 0x2e6   : > { %3131 = vmatpush1.msra.mxu0 %v4563_v58  ;;  %3164 = vmatprep.mubr.f32.mxu0 %v4236_v4 }
 0x2e7   : > { %3202 = vmatpush1.msra.mxu1 %v4585_v11  ;;  %4061 = vmatmul.mubr.msk.f32.vlgmr.msra.gmra.mxu0 %vm1066_vm4, %v4058_v12 }
 0x2e8   : > { %3235 = vmatprep.mubr.f32.mxu1 %v4236_v4  ;;  %3298 = vmatprep.subr.mxu0 %v4641_v44 }
 0x2e9   : > { %3369 = vmatprep.subr.mxu1 %v4701_v2  ;;  %4062 = vmatmul.mubr.msk.f32.vlgmr.msra.gmra.mxu1 %vm1066_vm4, %v4058_v12 }
 0x2ea   : > { %3299 = vmatpush1.msra.mxu0 %v4646_v46  ;;  %3370 = vmatpush1.msra.mxu1 %v4705_v3 }
 0x2eb   : > { %3300 = vmatprep.subr.mxu0 %v4651_v10  ;;  %3371 = vmatprep.subr.mxu1 %v4710_v5 }
 0x2ec   : > { %3301 = vmatpush1.msra.mxu0 %v4657_v48  ;;  %3372 = vmatpush1.msra.mxu1 %v4715_v49 }
 0x2ed   : > { %3302 = vmatprep.subr.mxu0 %v4663_v51  ;;  %3373 = vmatprep.subr.mxu1 %v4720_v7 }
 0x2ee   : > { %3303 = vmatpush1.msra.mxu0 %v4669_v52  ;;  %3374 = vmatpush1.msra.mxu1 %v4725_v9 }
 0x2ef   : > { %3304 = vmatprep.subr.mxu0 %v4675_v53  ;;  %3375 = vmatprep.subr.mxu1 %v4731_v13 }
 0x2f0   : > { %3305 = vmatpush1.msra.mxu0 %v4681_v55  ;;  %3376 = vmatpush1.msra.mxu1 %v4737_v45 }
 0x2f1   : > { %3306 = vmatprep.subr.mxu0 %v4527_v27  ;;  %3377 = vmatprep.subr.mxu1 %v4534_v32 }
 0x2f2   : > { %3307 = vmatpush1.msra.mxu0 %v4508_v16  ;;  %3378 = vmatpush1.msra.mxu1 %v4544_v39  ;;  %v5239_v18 = vpop.f32.mrf.mxu1 }
 0x2f3   : > { %3308 = vmatprep.subr.mxu0 %v4512_v19  ;;  %3379 = vmatprep.subr.mxu1 %v4520_v24 }
 0x2f4   : > { %3309 = vmatpush1.msra.mxu0 %v4488_v62  ;;  %3342 = vmatprep.mubr.f32.mxu0 %v4236_v4  ;;  %v5249_v20 = vpop.f32.mrf.mxu1 }
 0x2f5   : > { %3380 = vmatpush1.msra.mxu1 %v4490_v63  ;;  %4064 = vmatmul.mubr.msk.f32.vlgmr.msra.gmra.mxu0 %vm1066_vm4, %v4063_v14 }
 0x2f6   : > { %3413 = vmatprep.mubr.f32.mxu1 %v4236_v4  ;;  %3440 = vmatprep.subr.mxu0 %v4750_v23 }
 0x2f7   : > { %3511 = vmatprep.subr.mxu1 %v4760_v30  ;;  %4065 = vmatmul.mubr.msk.f32.vlgmr.msra.gmra.mxu1 %vm1066_vm4, %v4063_v14 }
 0x2f8   : > { %3441 = vmatpush1.msra.mxu0 %v4755_v26  ;;  %3512 = vmatpush1.msra.mxu1 %v4746_v61 }
 0x2f9   : > { %3442 = vmatprep.subr.mxu0 %v4767_v33  ;;  %3513 = vmatprep.subr.mxu1 %v4778_v29 }
 0x2fa   : > { %3443 = vmatpush1.msra.mxu0 %v4773_v35  ;;  %3514 = vmatpush1.msra.mxu1 %v4789_v42 }
 0x2fb   : > { %3444 = vmatprep.subr.mxu0 %v4793_v43  ;;  %3515 = vmatprep.subr.mxu1 %v4785_v38 }
 0x2fc   : > { %3445 = vmatpush1.msra.mxu0 %v4803_v31  ;;  %3516 = vmatpush1.msra.mxu1 %v4798_v25 }
 0x2fd   : > { %3446 = vmatprep.subr.mxu0 %v4812_v54  ;;  %3517 = vmatprep.subr.mxu1 %v4823_v59 }
 0x2fe   : > { %3447 = vmatpush1.msra.mxu0 %v4818_v56  ;;  %3518 = vmatpush1.msra.mxu1 %v4827_v60 }
 0x2ff   : > { %3448 = vmatprep.subr.mxu0 %v4595_v17  ;;  %3519 = vmatprep.subr.mxu1 %v4602_v21 }
 0x300   : > { %3449 = vmatpush1.msra.mxu0 %v4588_v15  ;;  %3520 = vmatpush1.msra.mxu1 %v4608_v22  ;;  %v5255_v40 = vpop.f32.mrf.mxu1 }
 0x301   : > { %3450 = vmatprep.subr.mxu0 %v4568_v0  ;;  %3521 = vmatprep.subr.mxu1 %v4579_v8 }
 0x302   : > { %3451 = vmatpush1.msra.mxu0 %v4563_v58  ;;  %3484 = vmatprep.mubr.f32.mxu0 %v4236_v4  ;;  %v1351_v34 = vpop.f32.mrf.mxu1 }
 0x303   : > { %3522 = vmatpush1.msra.mxu1 %v4585_v11  ;;  %4066 = vmatmul.mubr.msk.f32.vlgmr.msra.gmra.mxu0 %vm1066_vm4, %v4063_v14 }
 0x304   : > { %3555 = vmatprep.mubr.f32.mxu1 %v4236_v4  ;;  %3618 = vmatprep.subr.mxu0 %v4641_v44  ;;  %v5283_v44 = vpop.f32.mrf.mxu0 }
 0x305   : > { %3689 = vmatprep.subr.mxu1 %v4701_v2  ;;  %4067 = vmatmul.mubr.msk.f32.vlgmr.msra.gmra.mxu1 %vm1066_vm4, %v4063_v14 }
 0x306   : > { %3619 = vmatpush1.msra.mxu0 %v4646_v46  ;;  %3690 = vmatpush1.msra.mxu1 %v4705_v3  ;;  %v4068_v46 = vld [vmem:[%s5563_s7 + $0x40] sm:$0xff] }
 0x307   : > { %3620 = vmatprep.subr.mxu0 %v4651_v10  ;;  %3691 = vmatprep.subr.mxu1 %v4710_v5 }
 0x308   : > { %3621 = vmatpush1.msra.mxu0 %v4657_v48  ;;  %3692 = vmatpush1.msra.mxu1 %v4715_v49 }
 0x309   : > { %3622 = vmatprep.subr.mxu0 %v4663_v51  ;;  %3693 = vmatprep.subr.mxu1 %v4720_v7 }
 0x30a   : > { %3623 = vmatpush1.msra.mxu0 %v4669_v52  ;;  %3694 = vmatpush1.msra.mxu1 %v4725_v9 }
 0x30b   : > { %3624 = vmatprep.subr.mxu0 %v4675_v53  ;;  %3695 = vmatprep.subr.mxu1 %v4731_v13 }
 0x30c   : > { %3625 = vmatpush1.msra.mxu0 %v4681_v55  ;;  %3696 = vmatpush1.msra.mxu1 %v4737_v45 }
 0x30d   : > { %3626 = vmatprep.subr.mxu0 %v4527_v27  ;;  %3697 = vmatprep.subr.mxu1 %v4534_v32 }
 0x30e   : > { %3627 = vmatpush1.msra.mxu0 %v4508_v16  ;;  %3698 = vmatpush1.msra.mxu1 %v4544_v39  ;;  %v5296_v16 = vpop.f32.mrf.mxu0 }
 0x30f   : > { %3628 = vmatprep.subr.mxu0 %v4512_v19  ;;  %3699 = vmatprep.subr.mxu1 %v4520_v24  ;;  %v1495_v27 = vpop.f32.mrf.mxu1 }
 0x310   : > { %3629 = vmatpush1.msra.mxu0 %v4488_v62  ;;  %3662 = vmatprep.mubr.f32.mxu0 %v4236_v4  ;;  %v5304_v62 = vpop.f32.mrf.mxu0 }
 0x311   : > { %3700 = vmatpush1.msra.mxu1 %v4490_v63  ;;  %4069 = vmatmul.mubr.msk.f32.vlgmr.msra.gmra.mxu0 %vm1066_vm4, %v4068_v46  ;;  %v1497_v32 = vpop.f32.mrf.mxu1 }
 0x312   : > { %3733 = vmatprep.mubr.f32.mxu1 %v4236_v4  ;;  %3760 = vmatprep.subr.mxu0 %v4750_v23  ;;  %v5314_v63 = vpop.f32.mrf.mxu0 }
 0x313   : > { %3831 = vmatprep.subr.mxu1 %v4760_v30  ;;  %4070 = vmatmul.mubr.msk.f32.vlgmr.msra.gmra.mxu1 %vm1066_vm4, %v4068_v46 }
 0x314   : > { %3761 = vmatpush1.msra.mxu0 %v4755_v26  ;;  %3832 = vmatpush1.msra.mxu1 %v4746_v61  ;;  %v1424_v19 = vpop.f32.mrf.mxu0 }
 0x315   : > { %3762 = vmatprep.subr.mxu0 %v4767_v33  ;;  %3833 = vmatprep.subr.mxu1 %v4778_v29 }
 0x316   : > { %3763 = vmatpush1.msra.mxu0 %v4773_v35  ;;  %3834 = vmatpush1.msra.mxu1 %v4789_v42  ;;  %v1426_v24 = vpop.f32.mrf.mxu0 }
 0x317   : > { %3764 = vmatprep.subr.mxu0 %v4793_v43  ;;  %3835 = vmatprep.subr.mxu1 %v4785_v38 }
 0x318   : > { %3765 = vmatpush1.msra.mxu0 %v4803_v31  ;;  %3836 = vmatpush1.msra.mxu1 %v4798_v25  ;;  %v1064_v25 = vpop.permute.xlu0 %1063 }
 0x319   : > { %3766 = vmatprep.subr.mxu0 %v4812_v54  ;;  %3837 = vmatprep.subr.mxu1 %v4823_v59  ;;  %v1137_v50 = vadd.f32 %v5283_v44, %v1064_v25  ;;  %v1208_v57 = vadd.f32 %v5239_v18, %v1064_v25  ;;  %v1210_v44 = vadd.f32 %v5249_v20, %v1064_v25 }
 0x31a   : > { %3767 = vmatpush1.msra.mxu0 %v4818_v56  ;;  %3838 = vmatpush1.msra.mxu1 %v4827_v60  ;;  %v1139_v60 = vadd.f32 %v5296_v16, %v1064_v25  ;;  %v1281_v20 = vadd.f32 %v5314_v63, %v1064_v25 }
 0x31b   : > { %3768 = vmatprep.subr.mxu0 %v4595_v17  ;;  %3839 = vmatprep.subr.mxu1 %v4602_v21  ;;  %v1566_v39 = vpop.f32.mrf.mxu0 }
 0x31c   : > { %3769 = vmatpush1.msra.mxu0 %v4588_v15  ;;  %3840 = vmatpush1.msra.mxu1 %v4608_v22 }
 0x31d   : > { %3770 = vmatprep.subr.mxu0 %v4568_v0  ;;  %3841 = vmatprep.subr.mxu1 %v4579_v8  ;;  %v1637_v0 = vpop.f32.mrf.mxu1 }
 0x31e   : > { %3771 = vmatpush1.msra.mxu0 %v4563_v58  ;;  %3804 = vmatprep.mubr.f32.mxu0 %v4236_v4  ;;  %v1568_v58 = vpop.f32.mrf.mxu0 }
 0x31f   : > { %3842 = vmatpush1.msra.mxu1 %v4585_v11  ;;  %4071 = vmatmul.mubr.msk.f32.vlgmr.msra.gmra.mxu0 %vm1066_vm4, %v4068_v46  ;;  %v1639_v8 = vpop.f32.mrf.mxu1 }
 0x320   : > { %3875 = vmatprep.mubr.f32.mxu1 %v4236_v4  ;;  %1642 = vrot.lane.b32.xlu1 %v1424_v19, %s4240_s19 }
 0x321   : > { %4072 = vmatmul.mubr.msk.f32.vlgmr.msra.gmra.mxu1 %vm1066_vm4, %v4068_v46  ;;  %1644 = vrot.lane.b32.xlu0 %v1426_v24, %s4240_s19  ;;  %v1279_v24 = vadd.f32 %v5304_v62, %v1064_v25 }
 0x324   : > { %1646 = vrot.lane.b32.xlu1 %v1495_v27, %s4240_s19 }
 0x325   : > { %1648 = vrot.lane.b32.xlu0 %v1497_v32, %s4240_s19 }
 0x328   : > { %1650 = vrot.lane.b32.xlu1 %v1566_v39, %s4240_s19 }
 0x329   : > { %1652 = vrot.lane.b32.xlu0 %v1568_v58, %s4240_s19  ;;  %v1744_v11 = vpop.f32.mrf.mxu0 }
 0x32b   : > { %v1746_v15 = vpop.f32.mrf.mxu0  ;;  %v1815_v17 = vpop.f32.mrf.mxu1 }
 0x32c   : > { %1654 = vrot.lane.b32.xlu1 %v1637_v0, %s4240_s19 }
 0x32d   : > { %1656 = vrot.lane.b32.xlu0 %v1639_v8, %s4240_s19  ;;  %v1817_v4 = vpop.f32.mrf.mxu1  ;;  %s5517_s19 = scalar_lea.hbm %s5565_s9, %s4078_s25 }
 0x330   : > { %1962 = vrot.lane.b32.xlu1 %v1744_v11, %s4241_s16 }
 0x331   : > { %1964 = vrot.lane.b32.xlu0 %v1746_v15, %s4241_s16  ;;  %v1350_v15 = vadd.f32 %v5255_v40, %v1064_v25 }
 0x334   : > { %1966 = vrot.lane.b32.xlu1 %v1815_v17, %s4241_s16 }
 0x335   : > { %1968 = vrot.lane.b32.xlu0 %v1817_v4, %s4241_s16 }
 0x337   : > { %v1886_v21 = vpop.f32.mrf.mxu0 }
 0x338   : > { %1970 = vrot.lane.b32.xlu1 %v1886_v21, %s4241_s16 }
 0x339   : > { %v1888_v22 = vpop.f32.mrf.mxu0  ;;  %v1957_v10 = vpop.f32.mrf.mxu1 }
 0x33a   : > { %1972 = vrot.lane.b32.xlu0 %v1888_v22, %s4241_s16 }
 0x33b   : > { %v1959_v48 = vpop.f32.mrf.mxu1 }
 0x33c   : > { %1974 = vrot.lane.b32.xlu1 %v1957_v10, %s4241_s16 }
 0x33e   : > { %1976 = vrot.lane.b32.xlu0 %v1959_v48, %s4241_s16  ;;  %s3921_s16 = scalar_lea.sflag [#allocation5], %s4397_s18 }
 0x345   : > { %v2064_v51 = vpop.f32.mrf.mxu0 }
 0x346   : > { %2282 = vrot.lane.b32.xlu1 %v2064_v51, %s4242_s17 }
 0x347   : > { %v2066_v52 = vpop.f32.mrf.mxu0  ;;  %v2135_v53 = vpop.f32.mrf.mxu1 }
 0x348   : > { %2284 = vrot.lane.b32.xlu0 %v2066_v52, %s4242_s17 }
 0x349   : > { %v2137_v55 = vpop.f32.mrf.mxu1 }
 0x34a   : > { %2286 = vrot.lane.b32.xlu1 %v2135_v53, %s4242_s17 }
 0x34c   : > { %2288 = vrot.lane.b32.xlu0 %v2137_v55, %s4242_s17 }
 0x353   : > { %v2206_v2 = vpop.f32.mrf.mxu0 }
 0x354   : > { %2290 = vrot.lane.b32.xlu1 %v2206_v2, %s4242_s17 }
 0x355   : > { %v2208_v3 = vpop.f32.mrf.mxu0  ;;  %v2277_v5 = vpop.f32.mrf.mxu1 }
 0x356   : > { %2292 = vrot.lane.b32.xlu0 %v2208_v3, %s4242_s17 }
 0x357   : > { %v2279_v49 = vpop.f32.mrf.mxu1 }
 0x358   : > { %2294 = vrot.lane.b32.xlu1 %v2277_v5, %s4242_s17 }
 0x35a   : > { %2296 = vrot.lane.b32.xlu0 %v2279_v49, %s4242_s17  ;;  %s4168_s17 = scalar_lea.vmem %s3936_s28, 896 }
 0x35b   : > { %p4169_p11 = scmp.ne.s32.totalorder %s3936_s28, %s4168_s17 }
 0x35d   : > { %p4170_p13 = pnand %p4169_p11, %p5579_p12 }
 0x35f   : > { %p4171_p1 = pneg %p4170_p13 }
 0x361   : > { %v2384_v7 = vpop.f32.mrf.mxu0 }
 0x362   : > { %2602 = vrot.lane.b32.xlu1 %v2384_v7, %s4243_s26 }
 0x363   : > { %v2386_v9 = vpop.f32.mrf.mxu0  ;;  %v2455_v13 = vpop.f32.mrf.mxu1 }
 0x364   : > { %2604 = vrot.lane.b32.xlu0 %v2386_v9, %s4243_s26 }
 0x365   : > { %v2457_v45 = vpop.f32.mrf.mxu1 }
 0x366   : > { %2606 = vrot.lane.b32.xlu1 %v2455_v13, %s4243_s26 }
 0x368   : > { %2608 = vrot.lane.b32.xlu0 %v2457_v45, %s4243_s26 }
 0x36f   : > { %v2526_v61 = vpop.f32.mrf.mxu0 }
 0x370   : > { %2610 = vrot.lane.b32.xlu1 %v2526_v61, %s4243_s26 }
 0x371   : > { %v2528_v23 = vpop.f32.mrf.mxu0  ;;  %v2597_v26 = vpop.f32.mrf.mxu1 }
 0x372   : > { %2612 = vrot.lane.b32.xlu0 %v2528_v23, %s4243_s26 }
 0x373   : > { %v2599_v30 = vpop.f32.mrf.mxu1 }
 0x374   : > { %2614 = vrot.lane.b32.xlu1 %v2597_v26, %s4243_s26 }
 0x376   : > { %2616 = vrot.lane.b32.xlu0 %v2599_v30, %s4243_s26  ;;  %s4248_s26 = smov [#allocation6]  }
 0x37d   : > { %v2704_v33 = vpop.f32.mrf.mxu0 }
 0x37e   : > { %2922 = vrot.lane.b32.xlu1 %v2704_v33, %s4244_s27 }
 0x37f   : > { %v2706_v35 = vpop.f32.mrf.mxu0  ;;  %v2775_v29 = vpop.f32.mrf.mxu1 }
 0x380   : > { %2924 = vrot.lane.b32.xlu0 %v2706_v35, %s4244_s27 }
 0x381   : > { %v2777_v36 = vpop.f32.mrf.mxu1 }
 0x382   : > { %2926 = vrot.lane.b32.xlu1 %v2775_v29, %s4244_s27 }
 0x384   : > { %2928 = vrot.lane.b32.xlu0 %v2777_v36, %s4244_s27 }
 0x38b   : > { %v2846_v38 = vpop.f32.mrf.mxu0 }
 0x38c   : > { %2930 = vrot.lane.b32.xlu1 %v2846_v38, %s4244_s27 }
 0x38d   : > { %v2848_v42 = vpop.f32.mrf.mxu0  ;;  %v2917_v43 = vpop.f32.mrf.mxu1 }
 0x38e   : > { %2932 = vrot.lane.b32.xlu0 %v2848_v42, %s4244_s27 }
 0x38f   : > { %v2919_v31 = vpop.f32.mrf.mxu1 }
 0x390   : > { %2934 = vrot.lane.b32.xlu1 %v2917_v43, %s4244_s27 }
 0x392   : > { %v1643_v47 = vpop.permute.xlu1 %1642  ;;  %2936 = vrot.lane.b32.xlu0 %v2919_v31, %s4244_s27  ;;  %s4172_s27 = sshll.u32 %s4248_s26, 4  ;;  %s4173_s27 = int_to_ptr.vmem [resolvable:$false] %s4172_s27 }
 0x393   : > { %v1645_v54 = vpop.permute.xlu0 %1644  ;;  %p4175_p3 = scmp.lt.s32.totalorder %s3936_s28, %s4173_s27 }
 0x394   : > { %v1665_v56 = vsel %vm1658_vm5, %v1643_v47, %v1645_v54 }
 0x395   : > { %v1666_v59 = vadd.f32 %v1665_v56, %v1137_v50 }
 0x396   : > { %v1647_v28 = vpop.permute.xlu1 %1646 }
 0x397   : > { %v1664_v41 = vsel %vm1658_vm5, %v1645_v54, %v1647_v28  ;;  %v1649_v1 = vpop.permute.xlu0 %1648 }
 0x398   : > { %v1667_v6 = vadd.f32 %v1664_v41, %v1139_v60  ;;  %v1663_v12 = vsel %vm1658_vm5, %v1647_v28, %v1649_v1 }
 0x399   : > { %v3024_v14 = vpop.f32.mrf.mxu0  ;;  %v1668_v34 = vadd.f32 %v1663_v12, %v1208_v57 }
 0x39a   : > { %3242 = vrot.lane.b32.xlu1 %v3024_v14, %s4245_s20  ;;  %v1651_v46 = vpop.permute.xlu1 %1650 }
 0x39b   : > { %v3026_v16 = vpop.f32.mrf.mxu0  ;;  %v3095_v19 = vpop.f32.mrf.mxu1  ;;  %v1662_v18 = vsel %vm1658_vm5, %v1649_v1, %v1651_v46 }
 0x39c   : > { %3244 = vrot.lane.b32.xlu0 %v3026_v16, %s4245_s20  ;;  %v1669_v27 = vadd.f32 %v1662_v18, %v1210_v44  ;;  %v1653_v32 = vpop.permute.xlu0 %1652 }
 0x39d   : > { %v3097_v39 = vpop.f32.mrf.mxu1  ;;  %v1661_v58 = vsel %vm1658_vm5, %v1651_v46, %v1653_v32 }
 0x39e   : > { %3246 = vrot.lane.b32.xlu1 %v3095_v19, %s4245_s20  ;;  %v1670_v0 = vadd.f32 %v1661_v58, %v1279_v24  ;;  %v1655_v8 = vpop.permute.xlu1 %1654 }
 0x39f   : > { %v1660_v11 = vsel %vm1658_vm5, %v1653_v32, %v1655_v8 }
 0x3a0   : > { %3248 = vrot.lane.b32.xlu0 %v3097_v39, %s4245_s20  ;;  %v1671_v62 = vadd.f32 %v1660_v11, %v1281_v20  ;;  %v1657_v17 = vpop.permute.xlu0 %1656 }
 0x3a1   : > { %v1659_v4 = vsel %vm1658_vm5, %v1655_v8, %v1657_v17 }
 0x3a2   : > { %v1672_v21 = vadd.f32 %v1659_v4, %v1350_v15  ;;  %v1963_v22 = vpop.permute.xlu1 %1962 }
 0x3a4   : > { %v1965_v63 = vpop.permute.xlu0 %1964 }
 0x3a5   : > { %v1985_v10 = vsel %vm1978_vm6, %v1963_v22, %v1965_v63 }
 0x3a6   : > { %v1986_v48 = vadd.f32 %v1985_v10, %v1666_v59  ;;  %v1967_v51 = vpop.permute.xlu1 %1966 }
 0x3a7   : > { %v3166_v52 = vpop.f32.mrf.mxu0  ;;  %v1984_v40 = vsel %vm1978_vm6, %v1965_v63, %v1967_v51 }
 0x3a8   : > { %3250 = vrot.lane.b32.xlu1 %v3166_v52, %s4245_s20  ;;  %v1987_v53 = vadd.f32 %v1984_v40, %v1667_v6  ;;  %v1969_v55 = vpop.permute.xlu0 %1968 }
 0x3a9   : > { %v3168_v2 = vpop.f32.mrf.mxu0  ;;  %v3237_v3 = vpop.f32.mrf.mxu1  ;;  %v1983_v5 = vsel %vm1978_vm6, %v1967_v51, %v1969_v55 }
 0x3aa   : > { %3252 = vrot.lane.b32.xlu0 %v3168_v2, %s4245_s20  ;;  %v1988_v49 = vadd.f32 %v1983_v5, %v1668_v34  ;;  %v1971_v7 = vpop.permute.xlu1 %1970 }
 0x3ab   : > { %v3239_v9 = vpop.f32.mrf.mxu1  ;;  %v1982_v13 = vsel %vm1978_vm6, %v1969_v55, %v1971_v7 }
 0x3ac   : > { %3254 = vrot.lane.b32.xlu1 %v3237_v3, %s4245_s20  ;;  %v1989_v45 = vadd.f32 %v1982_v13, %v1669_v27  ;;  %v1973_v61 = vpop.permute.xlu0 %1972 }
 0x3ad   : > { %v1981_v23 = vsel %vm1978_vm6, %v1971_v7, %v1973_v61 }
 0x3ae   : > { %3256 = vrot.lane.b32.xlu0 %v3239_v9, %s4245_s20  ;;  %v1990_v26 = vadd.f32 %v1981_v23, %v1670_v0  ;;  %v1975_v30 = vpop.permute.xlu1 %1974  ;;  %s4174_s20 = scalar_lea.vmem %s4173_s27, 1792 }
 0x3af   : > { %v1980_v33 = vsel %vm1978_vm6, %v1973_v61, %v1975_v30  ;;  %p4176_p5 = scmp.lt.s32.totalorder %s4174_s20, %s4168_s17 }
 0x3b0   : > { %v1991_v35 = vadd.f32 %v1980_v33, %v1671_v62  ;;  %v1977_v29 = vpop.permute.xlu0 %1976 }
 0x3b1   : > { %v1979_v36 = vsel %vm1978_vm6, %v1975_v30, %v1977_v29  ;;  %p4177_p8 = por %p4176_p5, %p4175_p3 }
 0x3b2   : > { %v1992_v38 = vadd.f32 %v1979_v36, %v1672_v21 }
 0x3b3   : > { %p4178_p10 = pnand %p4177_p8, %p4171_p1 }
 0x3b5   : > { %v3344_v42 = vpop.f32.mrf.mxu0 }
 0x3b6   : > { %3562 = vrot.lane.b32.xlu1 %v3344_v42, %s4246_s23 }
 0x3b7   : > { %v3346_v43 = vpop.f32.mrf.mxu0  ;;  %v3415_v25 = vpop.f32.mrf.mxu1 }
 0x3b8   : > { %3564 = vrot.lane.b32.xlu0 %v3346_v43, %s4246_s23  ;;  %v2283_v31 = vpop.permute.xlu1 %2282 }
 0x3b9   : > { %v3417_v47 = vpop.f32.mrf.mxu1 }
 0x3ba   : > { %3566 = vrot.lane.b32.xlu1 %v3415_v25, %s4246_s23  ;;  %v2285_v50 = vpop.permute.xlu0 %2284 }
 0x3bb   : > { %v2305_v54 = vsel %vm2298_vm7, %v2283_v31, %v2285_v50 }
 0x3bc   : > { %3568 = vrot.lane.b32.xlu0 %v3417_v47, %s4246_s23  ;;  %v5383_v56 = vadd.f32 %v2305_v54, %v1986_v48  ;;  %v2287_v59 = vpop.permute.xlu1 %2286 }
 0x3bd   : > { %v2304_v60 = vsel %vm2298_vm7, %v2285_v50, %v2287_v59 }
 0x3be   : > { %v5387_v28 = vadd.f32 %v2304_v60, %v1987_v53  ;;  %v2289_v57 = vpop.permute.xlu0 %2288 }
 0x3bf   : > { %v2303_v41 = vsel %vm2298_vm7, %v2287_v59, %v2289_v57 }
 0x3c0   : > { %v2308_v1 = vadd.f32 %v2303_v41, %v1988_v49 }
 0x3c3   : > { %v3486_v6 = vpop.f32.mrf.mxu0 }
 0x3c4   : > { %3570 = vrot.lane.b32.xlu1 %v3486_v6, %s4246_s23 }
 0x3c5   : > { %v3488_v12 = vpop.f32.mrf.mxu0  ;;  %v3557_v14 = vpop.f32.mrf.mxu1 }
 0x3c6   : > { %3572 = vrot.lane.b32.xlu0 %v3488_v12, %s4246_s23  ;;  %v2291_v34 = vpop.permute.xlu1 %2290 }
 0x3c7   : > { %v3559_v44 = vpop.f32.mrf.mxu1  ;;  %v2302_v46 = vsel %vm2298_vm7, %v2289_v57, %v2291_v34 }
 0x3c8   : > { %3574 = vrot.lane.b32.xlu1 %v3557_v14, %s4246_s23  ;;  %v2309_v16 = vadd.f32 %v2302_v46, %v1989_v45  ;;  %v2293_v19 = vpop.permute.xlu0 %2292 }
 0x3c9   : > { %v2301_v18 = vsel %vm2298_vm7, %v2291_v34, %v2293_v19 }
 0x3ca   : > { %3576 = vrot.lane.b32.xlu0 %v3559_v44, %s4246_s23  ;;  %v2310_v24 = vadd.f32 %v2301_v18, %v1990_v26  ;;  %v2295_v27 = vpop.permute.xlu1 %2294 }
 0x3cb   : > { %v2300_v32 = vsel %vm2298_vm7, %v2293_v19, %v2295_v27 }
 0x3cc   : > { %v2311_v39 = vadd.f32 %v2300_v32, %v1991_v35  ;;  %v2297_v58 = vpop.permute.xlu0 %2296 }
 0x3cd   : > { %v2299_v20 = vsel %vm2298_vm7, %v2295_v27, %v2297_v58 }
 0x3ce   : > { %v2312_v0 = vadd.f32 %v2299_v20, %v1992_v38 }
 0x3d1   : > { %v3664_v8 = vpop.f32.mrf.mxu0 }
 0x3d2   : > { %3882 = vrot.lane.b32.xlu1 %v3664_v8, %s4247_s29 }
 0x3d3   : > { %v3666_v11 = vpop.f32.mrf.mxu0  ;;  %v3735_v15 = vpop.f32.mrf.mxu1 }
 0x3d4   : > { %3884 = vrot.lane.b32.xlu0 %v3666_v11, %s4247_s29  ;;  %v2603_v62 = vpop.permute.xlu1 %2602 }
 0x3d5   : > { %v3737_v17 = vpop.f32.mrf.mxu1 }
 0x3d6   : > { %3886 = vrot.lane.b32.xlu1 %v3735_v15, %s4247_s29  ;;  %v2605_v4 = vpop.permute.xlu0 %2604 }
 0x3d7   : > { %v2625_v34 = vsel %vm2618_vm8, %v2603_v62, %v2605_v4 }
 0x3d8   : > { %3888 = vrot.lane.b32.xlu0 %v3737_v17, %s4247_s29  ;;  %v2607_v21 = vpop.permute.xlu1 %2606  ;;  %v2626_v19 = vadd.f32 %v2625_v34, %v5383_v56 }
 0x3d9   : > { %v2624_v46 = vsel %vm2618_vm8, %v2605_v4, %v2607_v21 }
 0x3da   : > { %v2609_v22 = vpop.permute.xlu0 %2608  ;;  %v2627_v32 = vadd.f32 %v2624_v46, %v5387_v28 }
 0x3db   : > { %v2623_v63 = vsel %vm2618_vm8, %v2607_v21, %v2609_v22 }
 0x3dc   : > { %v5406_v10 = vadd.f32 %v2623_v63, %v2308_v1 }
 0x3df   : > { %v3806_v48 = vpop.f32.mrf.mxu0 }
 0x3e0   : > { %3890 = vrot.lane.b32.xlu1 %v3806_v48, %s4247_s29 }
 0x3e1   : > { %v3808_v51 = vpop.f32.mrf.mxu0  ;;  %v3877_v52 = vpop.f32.mrf.mxu1 }
 0x3e2   : > { %3892 = vrot.lane.b32.xlu0 %v3808_v51, %s4247_s29  ;;  %v2611_v40 = vpop.permute.xlu1 %2610 }
 0x3e3   : > { %v2622_v53 = vsel %vm2618_vm8, %v2609_v22, %v2611_v40  ;;  %v3879_v3 = vpop.f32.mrf.mxu1 }
 0x3e4   : > { %3894 = vrot.lane.b32.xlu1 %v3877_v52, %s4247_s29  ;;  %v5410_v55 = vadd.f32 %v2622_v53, %v2309_v16  ;;  %v2613_v2 = vpop.permute.xlu0 %2612 }
 0x3e5   : > { %v2621_v5 = vsel %vm2618_vm8, %v2611_v40, %v2613_v2 }
 0x3e6   : > { %3896 = vrot.lane.b32.xlu0 %v3879_v3, %s4247_s29  ;;  %v5414_v49 = vadd.f32 %v2621_v5, %v2310_v24  ;;  %v2615_v7 = vpop.permute.xlu1 %2614 }
 0x3e7   : > { %v2620_v9 = vsel %vm2618_vm8, %v2613_v2, %v2615_v7 }
 0x3e8   : > { %v5418_v13 = vadd.f32 %v2620_v9, %v2311_v39  ;;  %v2617_v45 = vpop.permute.xlu0 %2616 }
 0x3e9   : > { %v2619_v61 = vsel %vm2618_vm8, %v2615_v7, %v2617_v45 }
 0x3ea   : > { %v5422_v23 = vadd.f32 %v2619_v61, %v2312_v0 }
 0x3f0   : > { %v2923_v26 = vpop.permute.xlu1 %2922 }
 0x3f2   : > { %v2925_v30 = vpop.permute.xlu0 %2924 }
 0x3f3   : > { %v2945_v16 = vsel %vm2938_vm9, %v2923_v26, %v2925_v30 }
 0x3f4   : > { %v2927_v33 = vpop.permute.xlu1 %2926  ;;  %v2946_v39 = vadd.f32 %v2945_v16, %v2626_v19 }
 0x3f5   : > { %v2944_v24 = vsel %vm2938_vm9, %v2925_v30, %v2927_v33 }
 0x3f6   : > { %v2929_v35 = vpop.permute.xlu0 %2928  ;;  %v2947_v0 = vadd.f32 %v2944_v24, %v2627_v32 }
 0x3f7   : > { %v2943_v48 = vsel %vm2938_vm9, %v2927_v33, %v2929_v35 }
 0x3f8   : > { %v2948_v2 = vadd.f32 %v2943_v48, %v5406_v10 }
 0x3fe   : > { %v2931_v29 = vpop.permute.xlu1 %2930 }
 0x3ff   : > { %v2942_v40 = vsel %vm2938_vm9, %v2929_v35, %v2931_v29 }
 0x400   : > { %v2933_v36 = vpop.permute.xlu0 %2932  ;;  %v2949_v45 = vadd.f32 %v2942_v40, %v5410_v55 }
 0x401   : > { %v2941_v3 = vsel %vm2938_vm9, %v2931_v29, %v2933_v36 }
 0x402   : > { %v2935_v38 = vpop.permute.xlu1 %2934  ;;  %v2950_v33 = vadd.f32 %v2941_v3, %v5414_v49 }
 0x403   : > { %v2940_v5 = vsel %vm2938_vm9, %v2933_v36, %v2935_v38 }
 0x404   : > { %v2937_v42 = vpop.permute.xlu0 %2936  ;;  %v2951_v35 = vadd.f32 %v2940_v5, %v5418_v13 }
 0x405   : > { %v2939_v26 = vsel %vm2938_vm9, %v2935_v38, %v2937_v42 }
 0x406   : > { %v2952_v13 = vadd.f32 %v2939_v26, %v5422_v23 }
 0x40c   : > { %v5424_v43 = vpop.permute.xlu1 %3242 }
 0x40e   : > { %v3245_v25 = vpop.permute.xlu0 %3244 }
 0x410   : > { %v3247_v31 = vpop.permute.xlu1 %3246 }
 0x411   : > { %v3264_v27 = vsel %vm3258_vm10, %v3245_v25, %v3247_v31 }
 0x412   : > { %v3249_v47 = vpop.permute.xlu0 %3248  ;;  %v3266_v8 = vadd.f32 %v3264_v27, %v2946_v39 }
 0x413   : > { %v3263_v20 = vsel %vm3258_vm10, %v3247_v31, %v3249_v47 }
 0x414   : > { %v3267_v62 = vadd.f32 %v3263_v20, %v2947_v0 }
 0x41a   : > { %v3251_v50 = vpop.permute.xlu1 %3250 }
 0x41b   : > { %v3262_v53 = vsel %vm3258_vm10, %v3249_v47, %v3251_v50 }
 0x41c   : > { %v3253_v54 = vpop.permute.xlu0 %3252  ;;  %v3268_v61 = vadd.f32 %v3262_v53, %v2948_v2 }
 0x41d   : > { %v3261_v7 = vsel %vm3258_vm10, %v3251_v50, %v3253_v54 }
 0x41e   : > { %v3255_v59 = vpop.permute.xlu1 %3254  ;;  %v3269_v29 = vadd.f32 %v3261_v7, %v2949_v45 }
 0x41f   : > { %v3260_v10 = vsel %vm3258_vm10, %v3253_v54, %v3255_v59 }
 0x420   : > { %v3257_v60 = vpop.permute.xlu0 %3256  ;;  %v3270_v31 = vadd.f32 %v3260_v10, %v2950_v33 }
 0x421   : > { %v3259_v55 = vsel %vm3258_vm10, %v3255_v59, %v3257_v60  ;;  %v3265_v38 = vsel %vm3258_vm10, %v3257_v60, %v5424_v43 }
 0x428   : > { %v5426_v57 = vpop.permute.xlu1 %3562 }
 0x42a   : > { %v3565_v41 = vpop.permute.xlu0 %3564 }
 0x42c   : > { %v3567_v1 = vpop.permute.xlu1 %3566 }
 0x42d   : > { %v3584_v56 = vsel %vm3578_vm11, %v3565_v41, %v3567_v1  ;;  %v3271_v41 = vadd.f32 %v3259_v55, %v2951_v35 }
 0x42e   : > { %v3569_v6 = vpop.permute.xlu0 %3568  ;;  %v3586_v28 = vadd.f32 %v3584_v56, %v3266_v8 }
 0x42f   : > { %v3583_v15 = vsel %vm3578_vm11, %v3567_v1, %v3569_v6  ;;  %v3272_v1 = vadd.f32 %v3265_v38, %v2952_v13 }
 0x430   : > { %v3587_v21 = vadd.f32 %v3583_v15, %v3267_v62 }
 0x436   : > { %v3571_v12 = vpop.permute.xlu1 %3570 }
 0x437   : > { %v3582_v9 = vsel %vm3578_vm11, %v3569_v6, %v3571_v12 }
 0x438   : > { %v3573_v14 = vpop.permute.xlu0 %3572  ;;  %v3588_v36 = vadd.f32 %v3582_v9, %v3268_v61 }
 0x439   : > { %v3581_v30 = vsel %vm3578_vm11, %v3571_v12, %v3573_v14 }
 0x43a   : > { %v3575_v44 = vpop.permute.xlu1 %3574  ;;  %v3589_v47 = vadd.f32 %v3581_v30, %v3269_v29 }
 0x43b   : > { %v3580_v42 = vsel %vm3578_vm11, %v3573_v14, %v3575_v44 }
 0x43c   : > { %v3577_v18 = vpop.permute.xlu0 %3576  ;;  %v3590_v23 = vadd.f32 %v3580_v42, %v3270_v31 }
 0x43d   : > { %v3579_v59 = vsel %vm3578_vm11, %v3575_v44, %v3577_v18  ;;  %v3585_v43 = vsel %vm3578_vm11, %v3577_v18, %v5426_v57 }
 0x43e   : > { %v3591_v34 = vadd.f32 %v3579_v59, %v3271_v41  ;;  %v3592_v57 = vadd.f32 %v3585_v43, %v3272_v1 }
 0x444   : > { %v5443_v58 = vpop.permute.xlu1 %3882 }
 0x446   : > { %v3885_v11 = vpop.permute.xlu0 %3884 }
 0x448   : > { %v3887_v17 = vpop.permute.xlu1 %3886 }
 0x449   : > { %v3904_v4 = vsel %vm3898_vm12, %v3885_v11, %v3887_v17 }
 0x44a   : > { %v3906_v22 = vadd.f32 %v3904_v4, %v3586_v28  ;;  %v3889_v63 = vpop.permute.xlu0 %3888 }
 0x44b   : > { %v3903_v51 = vsel %vm3898_vm12, %v3887_v17, %v3889_v63 }
 0x44c   : > { %3913 = vst [vmem:[%s5459_s11] sm:$0xff] %v3906_v22  ;;  %v3907_v52 = vadd.f32 %v3903_v51, %v3587_v21 }
 0x44e   : > { %3914 = vst [vmem:[%s5459_s11 + $0x8] sm:$0xff] %v3907_v52 }
 0x452   : > { %v3891_v25 = vpop.permute.xlu1 %3890 }
 0x453   : > { %v3902_v49 = vsel %vm3898_vm12, %v3889_v63, %v3891_v25 }
 0x454   : > { %v3908_v50 = vadd.f32 %v3902_v49, %v3588_v36  ;;  %v3893_v54 = vpop.permute.xlu0 %3892 }
 0x455   : > { %v3901_v60 = vsel %vm3898_vm12, %v3891_v25, %v3893_v54 }
 0x456   : > { %3915 = vst [vmem:[%s5459_s11 + $0x10] sm:$0xff] %v3908_v50  ;;  %v3909_v6 = vadd.f32 %v3901_v60, %v3589_v47  ;;  %v3895_v12 = vpop.permute.xlu1 %3894 }
 0x457   : > { %v3900_v14 = vsel %vm3898_vm12, %v3893_v54, %v3895_v12 }
 0x458   : > { %3916 = vst [vmem:[%s5459_s11 + $0x18] sm:$0xff] %v3909_v6  ;;  %v3910_v44 = vadd.f32 %v3900_v14, %v3590_v23  ;;  %v3897_v46 = vpop.permute.xlu0 %3896 }
 0x459   : > { %v3899_v16 = vsel %vm3898_vm12, %v3895_v12, %v3897_v46  ;;  %v3905_v19 = vsel %vm3898_vm12, %v3897_v46, %v5443_v58 }
 0x45a   : > { %3917 = vst [vmem:[%s5459_s11 + $0x20] sm:$0xff] %v3910_v44  ;;  %v3911_v18 = vadd.f32 %v3899_v16, %v3591_v34  ;;  %v3912_v24 = vadd.f32 %v3905_v19, %v3592_v57 }
 0x45c   : > { %3918 = vst [vmem:[%s5459_s11 + $0x28] sm:$0xff] %v3911_v18  ;;  %3919 = vst [vmem:[%s5459_s11 + $0x30] sm:$0xff] %v3912_v24 }
 0x45d   : > { %4181 = shalt.err (!%p4178_p10)
}
 0x45e   : > { %s4182_s23 = scalar_lea.hbm %s5517_s19, 896  ;;  %s4186_s24 = scalar_lea.hbm %s5565_s9, 1792 }
 0x45f   : > { %p4183_p2 = scmp.ne.s32.totalorder %s5517_s19, %s4182_s23  ;;  %p4187_p7 = scmp.lt.s32.totalorder %s5517_s19, %s5565_s9 }
 0x460   : > { %p4188_p0 = scmp.lt.s32.totalorder %s4186_s24, %s4182_s23 }
 0x461   : > { %p4184_p4 = pnand %p4183_p2, %p5579_p12 }
 0x462   : > { %p4189_p6 = por %p4188_p0, %p4187_p7 }
 0x463   : > { %p4185_p9 = pneg %p4184_p4 }
 0x465   : > { %p4190_p11 = pnand %p4189_p6, %p4185_p9 }
 0x467   : > { %4193 = shalt.err (!%p4190_p11)
}
 0x468   : > { %4081 = dma.vmem_to_hbm [thread:$0]  (%p5579_p12), %s3936_s28, 896, %s5517_s19, %s3921_s16  }
 0x469 PF: > { %s3947_s13 = sand.u32 1, %s4220_s30   ;;  %p5580_p13 = scmp.ne.s32.totalorder %s5574_s22, 0 }
 0x46a   : > { %p5581_p1 = scmp.ge.s32.totalorder %s4232_s12, 2  ;;  %s3948_s14 = scalar_lea.sflag [#allocation5], %s3947_s13 }
 0x46c   : > { %p4088_p3 = pnand %p5581_p1, %p5580_p13 }
 0x46e   : > { %p4089_p5 = pneg %p4088_p3 }
 0x470   : > { %4215 = dma.done.wait (%p4089_p5), %s3948_s14, 896  }
 0x471   : > { %4217 = vsyncadd (%p4089_p5), %s3948_s14, 4294966400  ;;  %s5582_s17 = sld [smem:[#allocation9_spill]]  ;;  %p22_p8 = scmp.ge.s32.totalorder %s4324_s15, 4  }
 0x472   : > { %s5583_s11 = sld [smem:[#allocation10_spill]]  ;;  %s5584_s30 = smov %s4224_s10 }
 0x473   : > { %s5586_s12 = smov %s4324_s15  ;;  %24 = sbr.rel (!%p22_p8) target bundleno = 5 (0x5), region = 109 }
 0x477   : > { %s5585_s10 = smov %s5582_s17 }
 0x478   :  { %3953 = vsyncpa [#allocation4], 1 }
 0x479   :  { %3955 = vsyncpa [#allocation4 + $0x1], 1 }
 0x47a   :  { %3956 = vsyncpa [#allocation5], 1 }
 0x47b   :  { %3958 = vsyncpa [#allocation5 + $0x1], 1 }

</bundles_post_ra>
